<compile_context>
chip_gen: v6e
topology: v6e:2x2x1
jax: 0.10.0
libtpu: 0.0.40
codegen_flags: <defaults>
</compile_context>

<pallas_src>
import jax
import jax.numpy as jnp
import numpy as np
from jax import lax
from jax.experimental import pallas as pl
from jax.experimental.pallas import tpu as pltpu

# ----------------------------- configuration --------------------------------
DIM         = 32
NUM_HEADS   = 2
HEAD_DIM    = DIM // NUM_HEADS
PATCH_SIZE  = 8
NUM_WINDOWS = 4
N_TOKENS    = NUM_WINDOWS * PATCH_SIZE        # 32
MLP_RATIO   = 4.0
HIDDEN      = int(DIM * MLP_RATIO)            # 128
NUM_BLOCKS  = 2
SCALE       = HEAD_DIM ** (-0.5)
LN_EPS      = 1e-5
NEG_INF     = -1e9

# ------------------- packed slab layout (static row offsets) -----------------
# narrow slab: (N_TOKENS + NUM_BLOCKS*NR_STRIDE, DIM) f32
#   rows [0,32)          : block-diagonal additive attention mask
#   per block (stride 144, 8-aligned):
NR_STRIDE = 144
OFF_CPE, OFF_LN1G, OFF_LN1B          = 0, 3, 4
OFF_BATTN, OFF_LN2G, OFF_LN2B, OFF_B2 = 5, 6, 7, 8
OFF_W2 = 16                                   # rows [16, 16+HIDDEN): MLP fc2 (128,32)
# wide slab: (NUM_BLOCKS*WR_STRIDE, 4*DIM) f32  (lane-dense, 128 lanes)
#   per block (stride 72, 8-aligned):
WR_STRIDE = 72
OFF_WBIG, OFF_W1, OFF_BBIG, OFF_B1 = 0, 32, 64, 65
N_NARROW_ROWS = N_TOKENS + NUM_BLOCKS * NR_STRIDE     # 320
N_WIDE_ROWS   = NUM_BLOCKS * WR_STRIDE                # 144


# ------------------------------ fused kernel ---------------------------------
def _layer_norm(x, g, b):
    mu = jnp.mean(x, axis=-1, keepdims=True)
    var = jnp.mean((x - mu) ** 2, axis=-1, keepdims=True)
    return (x - mu) * lax.rsqrt(var + LN_EPS) * g + b


def octformer_stage_kernel(x_ref, nslab_ref, wslab_ref, o_ref):
    """[CPE -> LN1 -> windowed-MHA -> +res -> LN2 -> MLP -> +res] x NUM_BLOCKS, fully in VMEM."""
    x = x_ref[...]                                     # (N, C)
    big_mask = nslab_ref[0:N_TOKENS, :]                # (N, N) block-diagonal additive mask

    # ---- loop-invariant constants (hoisted out of the unrolled block loop) ----
    row = lax.broadcasted_iota(jnp.int32, (N_TOKENS, DIM), 0)
    is_first = row == 0
    is_last = row == (N_TOKENS - 1)
    lane = lax.broadcasted_iota(jnp.int32, (1, DIM), 1)
    head_masks = [jnp.logical_and(lane >= h * HEAD_DIM,
                                  lane < (h + 1) * HEAD_DIM).astype(jnp.float32)
                  for h in range(NUM_HEADS)]

    for blk in range(NUM_BLOCKS):                      # static unroll over blocks
        nb = N_TOKENS + blk * NR_STRIDE
        wb = blk * WR_STRIDE

        # --- CPE (k=3 depthwise conv over token axis, BN == identity) + residual ---
        cw = nslab_ref[nb + OFF_CPE: nb + OFF_CPE + 3, :]          # (3, C)
        x_prev = jnp.where(is_first, 0.0, pltpu.roll(x, shift=1, axis=0))
        x_next = jnp.where(is_last, 0.0, pltpu.roll(x, shift=N_TOKENS - 1, axis=0))
        x = x + (x_prev * cw[0:1, :] + x * cw[1:2, :] + x_next * cw[2:3, :])

        # --- LN1 + windowed multi-head attention ---
        xn = _layer_norm(x,
                         nslab_ref[nb + OFF_LN1G: nb + OFF_LN1G + 1, :],
                         nslab_ref[nb + OFF_LN1B: nb + OFF_LN1B + 1, :])

        # single fused lane-dense projection: [Q*scale | K | V'_h0 | V'_h1] = (32,32)x(32,128)
        proj = (jnp.dot(xn, wslab_ref[wb + OFF_WBIG: wb + OFF_WBIG + DIM, :],
                        preferred_element_type=jnp.float32)
                + wslab_ref[wb + OFF_BBIG: wb + OFF_BBIG + 1, :])   # (N, 128)
        q_all = proj[:, 0:DIM]                                      # both heads' scaled q
        k_all = proj[:, DIM:2 * DIM]                                # both heads' k

        acc = None
        for h in range(NUM_HEADS):                                  # static unroll
            # lane-masking q selects head h in the shared (token, C) layout -> no 16-lane slices
            s = lax.dot_general(q_all * head_masks[h], k_all,
                                (((1,), (1,)), ((), ())),
                                preferred_element_type=jnp.float32)  # q_h @ k_h^T, (N, N)
            s = s + big_mask
            s = s - jnp.max(s, axis=-1, keepdims=True)
            p = jnp.exp(s)
            p = p * pl.reciprocal(jnp.sum(p, axis=-1, keepdims=True), approx=True)
            v_h = proj[:, (2 + h) * DIM:(3 + h) * DIM]               # proj-folded V', (N, C)
            oh = jnp.dot(p, v_h, preferred_element_type=jnp.float32)
            acc = oh if acc is None else acc + oh
        # gamma1 == 1 (layer_scale=None), drop_path identity; bias carries b_proj + folded bv@Wp
        x = x + acc + nslab_ref[nb + OFF_BATTN: nb + OFF_BATTN + 1, :]

        # --- LN2 + MLP (tanh-approx GELU) + residual ---
        x2 = _layer_norm(x,
                         nslab_ref[nb + OFF_LN2G: nb + OFF_LN2G + 1, :],
                         nslab_ref[nb + OFF_LN2B: nb + OFF_LN2B + 1, :])
        hdn = (jnp.dot(x2, wslab_ref[wb + OFF_W1: wb + OFF_W1 + DIM, :],
                       preferred_element_type=jnp.float32)
               + wslab_ref[wb + OFF_B1: wb + OFF_B1 + 1, :])
        hdn = jax.nn.gelu(hdn, approximate=True)
        x = x + (jnp.dot(hdn, nslab_ref[nb + OFF_W2: nb + OFF_W2 + HIDDEN, :],
                         preferred_element_type=jnp.float32)
                 + nslab_ref[nb + OFF_B2: nb + OFF_B2 + 1, :])

    o_ref[...] = x


# ------------------------------ host wrapper ----------------------------------
@jax.jit
def pallas_stage(data, nslab, wslab):
    # grid=() single invocation: everything (<300 KiB) is resident in VMEM; no tiling needed.
    return pl.pallas_call(
        octformer_stage_kernel,
        out_shape=jax.ShapeDtypeStruct((N_TOKENS, DIM), jnp.float32),
    )(data, nslab, wslab)


def pack_params(params, patch_mask):
    """One-time host-side packing into the two slabs (numpy, f64 for the weight folds)."""
    f64 = lambda a: np.asarray(a, np.float64)

    big = np.full((N_TOKENS, N_TOKENS), NEG_INF, np.float64)
    pm = f64(patch_mask)
    for w in range(NUM_WINDOWS):
        s = w * PATCH_SIZE
        big[s:s + PATCH_SIZE, s:s + PATCH_SIZE] = pm[w]

    nslab = np.zeros((N_NARROW_ROWS, DIM), np.float64)
    wslab = np.zeros((N_WIDE_ROWS, 4 * DIM), np.float64)
    nslab[0:N_TOKENS] = big

    for b, p in enumerate(params):
        wqkv, bqkv = f64(p['w_qkv']), f64(p['b_qkv'])
        wq, wk, wv = wqkv[:, :DIM], wqkv[:, DIM:2 * DIM], wqkv[:, 2 * DIM:]
        bq, bk, bv = bqkv[:, :DIM], bqkv[:, DIM:2 * DIM], bqkv[:, 2 * DIM:]
        wp, bp = f64(p['w_proj']), f64(p['b_proj'])

        # fold output projection into V per head; its bias folds into one additive vector
        wv_f, bv_f = [], np.zeros((1, DIM))
        for h in range(NUM_HEADS):
            sl = slice(h * HEAD_DIM, (h + 1) * HEAD_DIM)
            wv_f.append(wv[:, sl] @ wp[sl, :])
            bv_f = bv_f + bv[:, sl] @ wp[sl, :]

        nb = N_TOKENS + b * NR_STRIDE
        nslab[nb + OFF_CPE: nb + OFF_CPE + 3] = f64(p['cpe_w'])
        nslab[nb + OFF_LN1G] = f64(p['ln1_g'])[0]
        nslab[nb + OFF_LN1B] = f64(p['ln1_b'])[0]
        nslab[nb + OFF_BATTN] = (bp + bv_f)[0]
        nslab[nb + OFF_LN2G] = f64(p['ln2_g'])[0]
        nslab[nb + OFF_LN2B] = f64(p['ln2_b'])[0]
        nslab[nb + OFF_B2] = f64(p['b_fc2'])[0]
        nslab[nb + OFF_W2: nb + OFF_W2 + HIDDEN] = f64(p['w_fc2'])

        wb = b * WR_STRIDE
        wslab[wb + OFF_WBIG: wb + OFF_WBIG + DIM] = np.concatenate([wq * SCALE, wk] + wv_f, axis=1)
        wslab[wb + OFF_W1: wb + OFF_W1 + DIM] = f64(p['w_fc1'])
        wslab[wb + OFF_BBIG] = np.concatenate(
            [bq * SCALE, bk, np.zeros((1, NUM_HEADS * DIM))], axis=1)[0]
        wslab[wb + OFF_B1] = f64(p['b_fc1'])[0]

    return jnp.asarray(nslab, jnp.float32), jnp.asarray(wslab, jnp.float32)


# --------------------------- pure-JAX reference -------------------------------
def reference_stage(data, mask, params):
    def ln(y, g, b):
        mu = y.mean(-1, keepdims=True)
        var = ((y - mu) ** 2).mean(-1, keepdims=True)
        return (y - mu) / jnp.sqrt(var + LN_EPS) * g + b

    with jax.default_matmul_precision('highest'):
        for p in params:
            x = data
            x_prev = jnp.concatenate([jnp.zeros((1, DIM), x.dtype), x[:-1]], 0)
            x_next = jnp.concatenate([x[1:], jnp.zeros((1, DIM), x.dtype)], 0)
            cpe = (x_prev * p['cpe_w'][0] + x * p['cpe_w'][1] + x_next * p['cpe_w'][2])
            data = x + cpe
            win = data.reshape(NUM_WINDOWS, PATCH_SIZE, DIM)

            xn = ln(win, p['ln1_g'], p['ln1_b'])
            qkv = xn @ p['w_qkv'] + p['b_qkv']
            q, k, v = jnp.split(qkv, 3, axis=-1)

            def heads(t):
                return t.reshape(NUM_WINDOWS, PATCH_SIZE, NUM_HEADS,
                                 HEAD_DIM).transpose(0, 2, 1, 3)

            q, k, v = heads(q), heads(k), heads(v)
            attn = (q * SCALE) @ jnp.swapaxes(k, -2, -1) + mask[:, None]
            attn = jax.nn.softmax(attn, axis=-1)
            out = (attn @ v).transpose(0, 2, 1, 3).reshape(NUM_WINDOWS, PATCH_SIZE, DIM)
            out = out @ p['w_proj'] + p['b_proj']
            win = win + out

            xn2 = ln(win, p['ln2_g'], p['ln2_b'])
            h = jax.nn.gelu(xn2 @ p['w_fc1'] + p['b_fc1'], approximate=True)
            win = win + (h @ p['w_fc2'] + p['b_fc2'])
            data = win.reshape(N_TOKENS, DIM)
    return data


# ------------------------------- params ---------------------------------------
def init_params(key):
    params = []
    for _ in range(NUM_BLOCKS):
        key, *ks = jax.random.split(key, 8)

        def nrm(k, shape, s=0.02):
            return (s * jax.random.normal(k, shape)).astype(jnp.float32)

        params.append(dict(
            cpe_w=nrm(ks[0], (3, DIM), 0.1),
            ln1_g=jnp.ones((1, DIM), jnp.float32),
            ln1_b=jnp.zeros((1, DIM), jnp.float32),
            w_qkv=nrm(ks[1], (DIM, 3 * DIM)),
            b_qkv=nrm(ks[2], (1, 3 * DIM)),
            w_proj=nrm(ks[3], (DIM, DIM)),
            b_proj=jnp.zeros((1, DIM), jnp.float32),
            ln2_g=jnp.ones((1, DIM), jnp.float32),
            ln2_b=jnp.zeros((1, DIM), jnp.float32),
            w_fc1=nrm(ks[4], (DIM, HIDDEN)),
            b_fc1=nrm(ks[5], (1, HIDDEN)),
            w_fc2=nrm(ks[6], (HIDDEN, DIM)),
            b_fc2=jnp.zeros((1, DIM), jnp.float32),
        ))
    return params, key


# -------------------------------- main -----------------------------------------
if __name__ == "__main__":
    key = jax.random.PRNGKey(0)
    key, dkey = jax.random.split(key)
    data = jax.random.normal(dkey, (N_TOKENS, DIM), jnp.float32)
    # patch_mask: additive attention mask per window; zero (no padded tokens).
    mask = jnp.zeros((NUM_WINDOWS, PATCH_SIZE, PATCH_SIZE), jnp.float32)
    params, _ = init_params(key)

    # one-time host-side packing (weight folding + slab layout); not in the per-call path
    nslab, wslab = pack_params(params, mask)

    out = jax.block_until_ready(pallas_stage(data, nslab, wslab))
    ref = reference_stage(data, mask, params)

    assert out.shape == (N_TOKENS, DIM)
    np.testing.assert_allclose(np.asarray(out), np.asarray(ref), rtol=2e-2, atol=2e-2)
    print("KERNEL_OK")
</pallas_src>

<mosaic_0001>
module attributes {stable_mosaic.version = 11 : i64} {
  func.func @octformer_stage_kernel(%arg0: memref<32x32xf32, #tpu.memory_space<vmem>>, %arg1: memref<320x32xf32, #tpu.memory_space<vmem>>, %arg2: memref<144x128xf32, #tpu.memory_space<vmem>>, %arg3: memref<32x32xf32, #tpu.memory_space<vmem>>) attributes {dimension_semantics = [], scalar_prefetch = 0 : i64, scratch_operands = 0 : i64, tpu.core_type = #tpu.core_type<tc>} {
    %c0 = arith.constant 0 : index
    %c0_0 = arith.constant 0 : index
    %0 = vector.load %arg0[%c0, %c0_0] : memref<32x32xf32, #tpu.memory_space<vmem>>, vector<32x32xf32>
    %c0_1 = arith.constant 0 : index
    %c0_2 = arith.constant 0 : index
    %1 = vector.load %arg1[%c0_1, %c0_2] : memref<320x32xf32, #tpu.memory_space<vmem>>, vector<32x32xf32>
    %2 = tpu.iota {dimensions = array<i32: 0>} : vector<32x32xi32>
    %c0_i32 = arith.constant 0 : i32
    %3 = vector.broadcast %c0_i32 : i32 to vector<32x32xi32>
    %4 = arith.cmpi eq, %2, %3 : vector<32x32xi32>
    %c31_i32 = arith.constant 31 : i32
    %5 = vector.broadcast %c31_i32 : i32 to vector<32x32xi32>
    %6 = arith.cmpi eq, %2, %5 : vector<32x32xi32>
    %7 = tpu.iota {dimensions = array<i32: 1>} : vector<1x32xi32>
    %c0_i32_3 = arith.constant 0 : i32
    %8 = vector.broadcast %c0_i32_3 : i32 to vector<1x32xi32>
    %9 = arith.cmpi sge, %7, %8 : vector<1x32xi32>
    %c16_i32 = arith.constant 16 : i32
    %10 = vector.broadcast %c16_i32 : i32 to vector<1x32xi32>
    %11 = arith.cmpi slt, %7, %10 : vector<1x32xi32>
    %12 = arith.andi %9, %11 : vector<1x32xi1>
    %13 = arith.extui %12 : vector<1x32xi1> to vector<1x32xi32>
    %14 = arith.sitofp %13 : vector<1x32xi32> to vector<1x32xf32>
    %c16_i32_4 = arith.constant 16 : i32
    %15 = vector.broadcast %c16_i32_4 : i32 to vector<1x32xi32>
    %16 = arith.cmpi sge, %7, %15 : vector<1x32xi32>
    %c32_i32 = arith.constant 32 : i32
    %17 = vector.broadcast %c32_i32 : i32 to vector<1x32xi32>
    %18 = arith.cmpi slt, %7, %17 : vector<1x32xi32>
    %19 = arith.andi %16, %18 : vector<1x32xi1>
    %20 = arith.extui %19 : vector<1x32xi1> to vector<1x32xi32>
    %21 = arith.sitofp %20 : vector<1x32xi32> to vector<1x32xf32>
    %c32 = arith.constant 32 : index
    %c0_5 = arith.constant 0 : index
    %22 = vector.load %arg1[%c32, %c0_5] : memref<320x32xf32, #tpu.memory_space<vmem>>, vector<3x32xf32>
    %c1_i32 = arith.constant 1 : i32
    %23 = tpu.dynamic_rotate %0 by %c1_i32 dim 0 : vector<32x32xf32>, i32 -> vector<32x32xf32>
    %cst = arith.constant 0.000000e+00 : f32
    %24 = vector.broadcast %cst : f32 to vector<32x32xf32>
    %25 = arith.select %4, %24, %23 : vector<32x32xi1>, vector<32x32xf32>
    %c31_i32_6 = arith.constant 31 : i32
    %26 = tpu.dynamic_rotate %0 by %c31_i32_6 dim 0 : vector<32x32xf32>, i32 -> vector<32x32xf32>
    %cst_7 = arith.constant 0.000000e+00 : f32
    %27 = vector.broadcast %cst_7 : f32 to vector<32x32xf32>
    %28 = arith.select %6, %27, %26 : vector<32x32xi1>, vector<32x32xf32>
    %29 = vector.extract_strided_slice %22 {offsets = [0, 0], sizes = [1, 32], strides = [1, 1]} : vector<3x32xf32> to vector<1x32xf32>
    %30 = vector.broadcast %29 : vector<1x32xf32> to vector<32x32xf32>
    %31 = arith.mulf %25, %30 : vector<32x32xf32>
    %32 = vector.extract_strided_slice %22 {offsets = [1, 0], sizes = [1, 32], strides = [1, 1]} : vector<3x32xf32> to vector<1x32xf32>
    %33 = vector.broadcast %32 : vector<1x32xf32> to vector<32x32xf32>
    %34 = arith.mulf %0, %33 : vector<32x32xf32>
    %35 = arith.addf %31, %34 : vector<32x32xf32>
    %36 = vector.extract_strided_slice %22 {offsets = [2, 0], sizes = [1, 32], strides = [1, 1]} : vector<3x32xf32> to vector<1x32xf32>
    %37 = vector.broadcast %36 : vector<1x32xf32> to vector<32x32xf32>
    %38 = arith.mulf %28, %37 : vector<32x32xf32>
    %39 = arith.addf %35, %38 : vector<32x32xf32>
    %40 = arith.addf %0, %39 : vector<32x32xf32>
    %c35 = arith.constant 35 : index
    %c0_8 = arith.constant 0 : index
    %41 = vector.load %arg1[%c35, %c0_8] : memref<320x32xf32, #tpu.memory_space<vmem>>, vector<1x32xf32>
    %c36 = arith.constant 36 : index
    %c0_9 = arith.constant 0 : index
    %42 = vector.load %arg1[%c36, %c0_9] : memref<320x32xf32, #tpu.memory_space<vmem>>, vector<1x32xf32>
    %cst_10 = arith.constant dense<0.000000e+00> : vector<32xf32>
    %43 = vector.multi_reduction <add>, %40, %cst_10 [1] : vector<32x32xf32> to vector<32xf32>
    %44 = vector.shape_cast %43 : vector<32xf32> to vector<32x1xf32>
    %cst_11 = arith.constant 3.200000e+01 : f32
    %45 = vector.broadcast %cst_11 : f32 to vector<32x1xf32>
    %46 = arith.divf %44, %45 : vector<32x1xf32>
    %47 = vector.broadcast %46 : vector<32x1xf32> to vector<32x32xf32>
    %48 = arith.subf %40, %47 : vector<32x32xf32>
    %49 = arith.mulf %48, %48 : vector<32x32xf32>
    %cst_12 = arith.constant dense<0.000000e+00> : vector<32xf32>
    %50 = vector.multi_reduction <add>, %49, %cst_12 [1] : vector<32x32xf32> to vector<32xf32>
    %51 = vector.shape_cast %50 : vector<32xf32> to vector<32x1xf32>
    %cst_13 = arith.constant 3.200000e+01 : f32
    %52 = vector.broadcast %cst_13 : f32 to vector<32x1xf32>
    %53 = arith.divf %51, %52 : vector<32x1xf32>
    %54 = vector.broadcast %46 : vector<32x1xf32> to vector<32x32xf32>
    %55 = arith.subf %40, %54 : vector<32x32xf32>
    %cst_14 = arith.constant 9.99999974E-6 : f32
    %56 = vector.broadcast %cst_14 : f32 to vector<32x1xf32>
    %57 = arith.addf %53, %56 : vector<32x1xf32>
    %58 = math.rsqrt %57 : vector<32x1xf32>
    %59 = vector.broadcast %58 : vector<32x1xf32> to vector<32x32xf32>
    %60 = arith.mulf %55, %59 : vector<32x32xf32>
    %61 = vector.broadcast %41 : vector<1x32xf32> to vector<32x32xf32>
    %62 = arith.mulf %60, %61 : vector<32x32xf32>
    %63 = vector.broadcast %42 : vector<1x32xf32> to vector<32x32xf32>
    %64 = arith.addf %62, %63 : vector<32x32xf32>
    %c0_15 = arith.constant 0 : index
    %c0_16 = arith.constant 0 : index
    %65 = vector.load %arg2[%c0_15, %c0_16] : memref<144x128xf32, #tpu.memory_space<vmem>>, vector<32x128xf32>
    %cst_17 = arith.constant dense<0.000000e+00> : vector<32x128xf32>
    %66 = tpu.matmul %64, %65, %cst_17 {dimension_numbers = #tpu.dot_dimension_numbers<[1], [0], [0], [1], [0, 0, 1, 1], [], []>} : vector<32x32xf32>, vector<32x128xf32>, vector<32x128xf32> -> vector<32x128xf32>
    %c64 = arith.constant 64 : index
    %c0_18 = arith.constant 0 : index
    %67 = vector.load %arg2[%c64, %c0_18] : memref<144x128xf32, #tpu.memory_space<vmem>>, vector<1x128xf32>
    %68 = vector.broadcast %67 : vector<1x128xf32> to vector<32x128xf32>
    %69 = arith.addf %66, %68 : vector<32x128xf32>
    %70 = vector.extract_strided_slice %69 {offsets = [0, 0], sizes = [32, 32], strides = [1, 1]} : vector<32x128xf32> to vector<32x32xf32>
    %71 = vector.extract_strided_slice %69 {offsets = [0, 32], sizes = [32, 32], strides = [1, 1]} : vector<32x128xf32> to vector<32x32xf32>
    %72 = vector.broadcast %14 : vector<1x32xf32> to vector<32x32xf32>
    %73 = arith.mulf %70, %72 : vector<32x32xf32>
    %cst_19 = arith.constant dense<0.000000e+00> : vector<32x32xf32>
    %74 = tpu.matmul %73, %71, %cst_19 {dimension_numbers = #tpu.dot_dimension_numbers<[1], [1], [0], [0], [0, 0, 1, 0], [], []>} : vector<32x32xf32>, vector<32x32xf32>, vector<32x32xf32> -> vector<32x32xf32>
    %75 = arith.addf %74, %1 : vector<32x32xf32>
    %cst_20 = arith.constant dense<0xFF800000> : vector<32xf32>
    %76 = vector.multi_reduction <maximumf>, %75, %cst_20 [1] : vector<32x32xf32> to vector<32xf32>
    %77 = vector.shape_cast %76 : vector<32xf32> to vector<32x1xf32>
    %78 = vector.broadcast %77 : vector<32x1xf32> to vector<32x32xf32>
    %79 = arith.subf %75, %78 : vector<32x32xf32>
    %80 = math.exp %79 : vector<32x32xf32>
    %cst_21 = arith.constant dense<0.000000e+00> : vector<32xf32>
    %81 = vector.multi_reduction <add>, %80, %cst_21 [1] : vector<32x32xf32> to vector<32xf32>
    %82 = vector.shape_cast %81 : vector<32xf32> to vector<32x1xf32>
    %83 = tpu.reciprocal %82 {approx = true} : vector<32x1xf32> -> vector<32x1xf32>
    %84 = vector.broadcast %83 : vector<32x1xf32> to vector<32x32xf32>
    %85 = arith.mulf %80, %84 : vector<32x32xf32>
    %86 = vector.extract_strided_slice %69 {offsets = [0, 64], sizes = [32, 32], strides = [1, 1]} : vector<32x128xf32> to vector<32x32xf32>
    %cst_22 = arith.constant dense<0.000000e+00> : vector<32x32xf32>
    %87 = tpu.matmul %85, %86, %cst_22 {dimension_numbers = #tpu.dot_dimension_numbers<[1], [0], [0], [1], [0, 0, 1, 1], [], []>} : vector<32x32xf32>, vector<32x32xf32>, vector<32x32xf32> -> vector<32x32xf32>
    %88 = vector.broadcast %21 : vector<1x32xf32> to vector<32x32xf32>
    %89 = arith.mulf %70, %88 : vector<32x32xf32>
    %cst_23 = arith.constant dense<0.000000e+00> : vector<32x32xf32>
    %90 = tpu.matmul %89, %71, %cst_23 {dimension_numbers = #tpu.dot_dimension_numbers<[1], [1], [0], [0], [0, 0, 1, 0], [], []>} : vector<32x32xf32>, vector<32x32xf32>, vector<32x32xf32> -> vector<32x32xf32>
    %91 = arith.addf %90, %1 : vector<32x32xf32>
    %cst_24 = arith.constant dense<0xFF800000> : vector<32xf32>
    %92 = vector.multi_reduction <maximumf>, %91, %cst_24 [1] : vector<32x32xf32> to vector<32xf32>
    %93 = vector.shape_cast %92 : vector<32xf32> to vector<32x1xf32>
    %94 = vector.broadcast %93 : vector<32x1xf32> to vector<32x32xf32>
    %95 = arith.subf %91, %94 : vector<32x32xf32>
    %96 = math.exp %95 : vector<32x32xf32>
    %cst_25 = arith.constant dense<0.000000e+00> : vector<32xf32>
    %97 = vector.multi_reduction <add>, %96, %cst_25 [1] : vector<32x32xf32> to vector<32xf32>
    %98 = vector.shape_cast %97 : vector<32xf32> to vector<32x1xf32>
    %99 = tpu.reciprocal %98 {approx = true} : vector<32x1xf32> -> vector<32x1xf32>
    %100 = vector.broadcast %99 : vector<32x1xf32> to vector<32x32xf32>
    %101 = arith.mulf %96, %100 : vector<32x32xf32>
    %102 = vector.extract_strided_slice %69 {offsets = [0, 96], sizes = [32, 32], strides = [1, 1]} : vector<32x128xf32> to vector<32x32xf32>
    %cst_26 = arith.constant dense<0.000000e+00> : vector<32x32xf32>
    %103 = tpu.matmul %101, %102, %cst_26 {dimension_numbers = #tpu.dot_dimension_numbers<[1], [0], [0], [1], [0, 0, 1, 1], [], []>} : vector<32x32xf32>, vector<32x32xf32>, vector<32x32xf32> -> vector<32x32xf32>
    %104 = arith.addf %87, %103 : vector<32x32xf32>
    %105 = arith.addf %40, %104 : vector<32x32xf32>
    %c37 = arith.constant 37 : index
    %c0_27 = arith.constant 0 : index
    %106 = vector.load %arg1[%c37, %c0_27] : memref<320x32xf32, #tpu.memory_space<vmem>>, vector<1x32xf32>
    %107 = vector.broadcast %106 : vector<1x32xf32> to vector<32x32xf32>
    %108 = arith.addf %105, %107 : vector<32x32xf32>
    %c38 = arith.constant 38 : index
    %c0_28 = arith.constant 0 : index
    %109 = vector.load %arg1[%c38, %c0_28] : memref<320x32xf32, #tpu.memory_space<vmem>>, vector<1x32xf32>
    %c39 = arith.constant 39 : index
    %c0_29 = arith.constant 0 : index
    %110 = vector.load %arg1[%c39, %c0_29] : memref<320x32xf32, #tpu.memory_space<vmem>>, vector<1x32xf32>
    %cst_30 = arith.constant dense<0.000000e+00> : vector<32xf32>
    %111 = vector.multi_reduction <add>, %108, %cst_30 [1] : vector<32x32xf32> to vector<32xf32>
    %112 = vector.shape_cast %111 : vector<32xf32> to vector<32x1xf32>
    %cst_31 = arith.constant 3.200000e+01 : f32
    %113 = vector.broadcast %cst_31 : f32 to vector<32x1xf32>
    %114 = arith.divf %112, %113 : vector<32x1xf32>
    %115 = vector.broadcast %114 : vector<32x1xf32> to vector<32x32xf32>
    %116 = arith.subf %108, %115 : vector<32x32xf32>
    %117 = arith.mulf %116, %116 : vector<32x32xf32>
    %cst_32 = arith.constant dense<0.000000e+00> : vector<32xf32>
    %118 = vector.multi_reduction <add>, %117, %cst_32 [1] : vector<32x32xf32> to vector<32xf32>
    %119 = vector.shape_cast %118 : vector<32xf32> to vector<32x1xf32>
    %cst_33 = arith.constant 3.200000e+01 : f32
    %120 = vector.broadcast %cst_33 : f32 to vector<32x1xf32>
    %121 = arith.divf %119, %120 : vector<32x1xf32>
    %122 = vector.broadcast %114 : vector<32x1xf32> to vector<32x32xf32>
    %123 = arith.subf %108, %122 : vector<32x32xf32>
    %cst_34 = arith.constant 9.99999974E-6 : f32
    %124 = vector.broadcast %cst_34 : f32 to vector<32x1xf32>
    %125 = arith.addf %121, %124 : vector<32x1xf32>
    %126 = math.rsqrt %125 : vector<32x1xf32>
    %127 = vector.broadcast %126 : vector<32x1xf32> to vector<32x32xf32>
    %128 = arith.mulf %123, %127 : vector<32x32xf32>
    %129 = vector.broadcast %109 : vector<1x32xf32> to vector<32x32xf32>
    %130 = arith.mulf %128, %129 : vector<32x32xf32>
    %131 = vector.broadcast %110 : vector<1x32xf32> to vector<32x32xf32>
    %132 = arith.addf %130, %131 : vector<32x32xf32>
    %c32_35 = arith.constant 32 : index
    %c0_36 = arith.constant 0 : index
    %133 = vector.load %arg2[%c32_35, %c0_36] : memref<144x128xf32, #tpu.memory_space<vmem>>, vector<32x128xf32>
    %cst_37 = arith.constant dense<0.000000e+00> : vector<32x128xf32>
    %134 = tpu.matmul %132, %133, %cst_37 {dimension_numbers = #tpu.dot_dimension_numbers<[1], [0], [0], [1], [0, 0, 1, 1], [], []>} : vector<32x32xf32>, vector<32x128xf32>, vector<32x128xf32> -> vector<32x128xf32>
    %c65 = arith.constant 65 : index
    %c0_38 = arith.constant 0 : index
    %135 = vector.load %arg2[%c65, %c0_38] : memref<144x128xf32, #tpu.memory_space<vmem>>, vector<1x128xf32>
    %136 = vector.broadcast %135 : vector<1x128xf32> to vector<32x128xf32>
    %137 = arith.addf %134, %136 : vector<32x128xf32>
    %138 = arith.mulf %137, %137 : vector<32x128xf32>
    %139 = arith.mulf %137, %138 : vector<32x128xf32>
    %cst_39 = arith.constant 4.471500e-02 : f32
    %140 = vector.broadcast %cst_39 : f32 to vector<32x128xf32>
    %141 = arith.mulf %140, %139 : vector<32x128xf32>
    %142 = arith.addf %137, %141 : vector<32x128xf32>
    %cst_40 = arith.constant 0.797884583 : f32
    %143 = vector.broadcast %cst_40 : f32 to vector<32x128xf32>
    %144 = arith.mulf %143, %142 : vector<32x128xf32>
    %145 = math.tanh %144 : vector<32x128xf32>
    %cst_41 = arith.constant 1.000000e+00 : f32
    %146 = vector.broadcast %cst_41 : f32 to vector<32x128xf32>
    %147 = arith.addf %146, %145 : vector<32x128xf32>
    %cst_42 = arith.constant 5.000000e-01 : f32
    %148 = vector.broadcast %cst_42 : f32 to vector<32x128xf32>
    %149 = arith.mulf %148, %147 : vector<32x128xf32>
    %150 = arith.mulf %137, %149 : vector<32x128xf32>
    %c48 = arith.constant 48 : index
    %c0_43 = arith.constant 0 : index
    %151 = vector.load %arg1[%c48, %c0_43] : memref<320x32xf32, #tpu.memory_space<vmem>>, vector<128x32xf32>
    %cst_44 = arith.constant dense<0.000000e+00> : vector<32x32xf32>
    %152 = tpu.matmul %150, %151, %cst_44 {dimension_numbers = #tpu.dot_dimension_numbers<[1], [0], [0], [1], [0, 0, 1, 1], [], []>} : vector<32x128xf32>, vector<128x32xf32>, vector<32x32xf32> -> vector<32x32xf32>
    %c40 = arith.constant 40 : index
    %c0_45 = arith.constant 0 : index
    %153 = vector.load %arg1[%c40, %c0_45] : memref<320x32xf32, #tpu.memory_space<vmem>>, vector<1x32xf32>
    %154 = vector.broadcast %153 : vector<1x32xf32> to vector<32x32xf32>
    %155 = arith.addf %152, %154 : vector<32x32xf32>
    %156 = arith.addf %108, %155 : vector<32x32xf32>
    %c176 = arith.constant 176 : index
    %c0_46 = arith.constant 0 : index
    %157 = vector.load %arg1[%c176, %c0_46] : memref<320x32xf32, #tpu.memory_space<vmem>>, vector<3x32xf32>
    %c1_i32_47 = arith.constant 1 : i32
    %158 = tpu.dynamic_rotate %156 by %c1_i32_47 dim 0 : vector<32x32xf32>, i32 -> vector<32x32xf32>
    %cst_48 = arith.constant 0.000000e+00 : f32
    %159 = vector.broadcast %cst_48 : f32 to vector<32x32xf32>
    %160 = arith.select %4, %159, %158 : vector<32x32xi1>, vector<32x32xf32>
    %c31_i32_49 = arith.constant 31 : i32
    %161 = tpu.dynamic_rotate %156 by %c31_i32_49 dim 0 : vector<32x32xf32>, i32 -> vector<32x32xf32>
    %cst_50 = arith.constant 0.000000e+00 : f32
    %162 = vector.broadcast %cst_50 : f32 to vector<32x32xf32>
    %163 = arith.select %6, %162, %161 : vector<32x32xi1>, vector<32x32xf32>
    %164 = vector.extract_strided_slice %157 {offsets = [0, 0], sizes = [1, 32], strides = [1, 1]} : vector<3x32xf32> to vector<1x32xf32>
    %165 = vector.broadcast %164 : vector<1x32xf32> to vector<32x32xf32>
    %166 = arith.mulf %160, %165 : vector<32x32xf32>
    %167 = vector.extract_strided_slice %157 {offsets = [1, 0], sizes = [1, 32], strides = [1, 1]} : vector<3x32xf32> to vector<1x32xf32>
    %168 = vector.broadcast %167 : vector<1x32xf32> to vector<32x32xf32>
    %169 = arith.mulf %156, %168 : vector<32x32xf32>
    %170 = arith.addf %166, %169 : vector<32x32xf32>
    %171 = vector.extract_strided_slice %157 {offsets = [2, 0], sizes = [1, 32], strides = [1, 1]} : vector<3x32xf32> to vector<1x32xf32>
    %172 = vector.broadcast %171 : vector<1x32xf32> to vector<32x32xf32>
    %173 = arith.mulf %163, %172 : vector<32x32xf32>
    %174 = arith.addf %170, %173 : vector<32x32xf32>
    %175 = arith.addf %156, %174 : vector<32x32xf32>
    %c179 = arith.constant 179 : index
    %c0_51 = arith.constant 0 : index
    %176 = vector.load %arg1[%c179, %c0_51] : memref<320x32xf32, #tpu.memory_space<vmem>>, vector<1x32xf32>
    %c180 = arith.constant 180 : index
    %c0_52 = arith.constant 0 : index
    %177 = vector.load %arg1[%c180, %c0_52] : memref<320x32xf32, #tpu.memory_space<vmem>>, vector<1x32xf32>
    %cst_53 = arith.constant dense<0.000000e+00> : vector<32xf32>
    %178 = vector.multi_reduction <add>, %175, %cst_53 [1] : vector<32x32xf32> to vector<32xf32>
    %179 = vector.shape_cast %178 : vector<32xf32> to vector<32x1xf32>
    %cst_54 = arith.constant 3.200000e+01 : f32
    %180 = vector.broadcast %cst_54 : f32 to vector<32x1xf32>
    %181 = arith.divf %179, %180 : vector<32x1xf32>
    %182 = vector.broadcast %181 : vector<32x1xf32> to vector<32x32xf32>
    %183 = arith.subf %175, %182 : vector<32x32xf32>
    %184 = arith.mulf %183, %183 : vector<32x32xf32>
    %cst_55 = arith.constant dense<0.000000e+00> : vector<32xf32>
    %185 = vector.multi_reduction <add>, %184, %cst_55 [1] : vector<32x32xf32> to vector<32xf32>
    %186 = vector.shape_cast %185 : vector<32xf32> to vector<32x1xf32>
    %cst_56 = arith.constant 3.200000e+01 : f32
    %187 = vector.broadcast %cst_56 : f32 to vector<32x1xf32>
    %188 = arith.divf %186, %187 : vector<32x1xf32>
    %189 = vector.broadcast %181 : vector<32x1xf32> to vector<32x32xf32>
    %190 = arith.subf %175, %189 : vector<32x32xf32>
    %cst_57 = arith.constant 9.99999974E-6 : f32
    %191 = vector.broadcast %cst_57 : f32 to vector<32x1xf32>
    %192 = arith.addf %188, %191 : vector<32x1xf32>
    %193 = math.rsqrt %192 : vector<32x1xf32>
    %194 = vector.broadcast %193 : vector<32x1xf32> to vector<32x32xf32>
    %195 = arith.mulf %190, %194 : vector<32x32xf32>
    %196 = vector.broadcast %176 : vector<1x32xf32> to vector<32x32xf32>
    %197 = arith.mulf %195, %196 : vector<32x32xf32>
    %198 = vector.broadcast %177 : vector<1x32xf32> to vector<32x32xf32>
    %199 = arith.addf %197, %198 : vector<32x32xf32>
    %c72 = arith.constant 72 : index
    %c0_58 = arith.constant 0 : index
    %200 = vector.load %arg2[%c72, %c0_58] : memref<144x128xf32, #tpu.memory_space<vmem>>, vector<32x128xf32>
    %cst_59 = arith.constant dense<0.000000e+00> : vector<32x128xf32>
    %201 = tpu.matmul %199, %200, %cst_59 {dimension_numbers = #tpu.dot_dimension_numbers<[1], [0], [0], [1], [0, 0, 1, 1], [], []>} : vector<32x32xf32>, vector<32x128xf32>, vector<32x128xf32> -> vector<32x128xf32>
    %c136 = arith.constant 136 : index
    %c0_60 = arith.constant 0 : index
    %202 = vector.load %arg2[%c136, %c0_60] : memref<144x128xf32, #tpu.memory_space<vmem>>, vector<1x128xf32>
    %203 = vector.broadcast %202 : vector<1x128xf32> to vector<32x128xf32>
    %204 = arith.addf %201, %203 : vector<32x128xf32>
    %205 = vector.extract_strided_slice %204 {offsets = [0, 0], sizes = [32, 32], strides = [1, 1]} : vector<32x128xf32> to vector<32x32xf32>
    %206 = vector.extract_strided_slice %204 {offsets = [0, 32], sizes = [32, 32], strides = [1, 1]} : vector<32x128xf32> to vector<32x32xf32>
    %207 = vector.broadcast %14 : vector<1x32xf32> to vector<32x32xf32>
    %208 = arith.mulf %205, %207 : vector<32x32xf32>
    %cst_61 = arith.constant dense<0.000000e+00> : vector<32x32xf32>
    %209 = tpu.matmul %208, %206, %cst_61 {dimension_numbers = #tpu.dot_dimension_numbers<[1], [1], [0], [0], [0, 0, 1, 0], [], []>} : vector<32x32xf32>, vector<32x32xf32>, vector<32x32xf32> -> vector<32x32xf32>
    %210 = arith.addf %209, %1 : vector<32x32xf32>
    %cst_62 = arith.constant dense<0xFF800000> : vector<32xf32>
    %211 = vector.multi_reduction <maximumf>, %210, %cst_62 [1] : vector<32x32xf32> to vector<32xf32>
    %212 = vector.shape_cast %211 : vector<32xf32> to vector<32x1xf32>
    %213 = vector.broadcast %212 : vector<32x1xf32> to vector<32x32xf32>
    %214 = arith.subf %210, %213 : vector<32x32xf32>
    %215 = math.exp %214 : vector<32x32xf32>
    %cst_63 = arith.constant dense<0.000000e+00> : vector<32xf32>
    %216 = vector.multi_reduction <add>, %215, %cst_63 [1] : vector<32x32xf32> to vector<32xf32>
    %217 = vector.shape_cast %216 : vector<32xf32> to vector<32x1xf32>
    %218 = tpu.reciprocal %217 {approx = true} : vector<32x1xf32> -> vector<32x1xf32>
    %219 = vector.broadcast %218 : vector<32x1xf32> to vector<32x32xf32>
    %220 = arith.mulf %215, %219 : vector<32x32xf32>
    %221 = vector.extract_strided_slice %204 {offsets = [0, 64], sizes = [32, 32], strides = [1, 1]} : vector<32x128xf32> to vector<32x32xf32>
    %cst_64 = arith.constant dense<0.000000e+00> : vector<32x32xf32>
    %222 = tpu.matmul %220, %221, %cst_64 {dimension_numbers = #tpu.dot_dimension_numbers<[1], [0], [0], [1], [0, 0, 1, 1], [], []>} : vector<32x32xf32>, vector<32x32xf32>, vector<32x32xf32> -> vector<32x32xf32>
    %223 = vector.broadcast %21 : vector<1x32xf32> to vector<32x32xf32>
    %224 = arith.mulf %205, %223 : vector<32x32xf32>
    %cst_65 = arith.constant dense<0.000000e+00> : vector<32x32xf32>
    %225 = tpu.matmul %224, %206, %cst_65 {dimension_numbers = #tpu.dot_dimension_numbers<[1], [1], [0], [0], [0, 0, 1, 0], [], []>} : vector<32x32xf32>, vector<32x32xf32>, vector<32x32xf32> -> vector<32x32xf32>
    %226 = arith.addf %225, %1 : vector<32x32xf32>
    %cst_66 = arith.constant dense<0xFF800000> : vector<32xf32>
    %227 = vector.multi_reduction <maximumf>, %226, %cst_66 [1] : vector<32x32xf32> to vector<32xf32>
    %228 = vector.shape_cast %227 : vector<32xf32> to vector<32x1xf32>
    %229 = vector.broadcast %228 : vector<32x1xf32> to vector<32x32xf32>
    %230 = arith.subf %226, %229 : vector<32x32xf32>
    %231 = math.exp %230 : vector<32x32xf32>
    %cst_67 = arith.constant dense<0.000000e+00> : vector<32xf32>
    %232 = vector.multi_reduction <add>, %231, %cst_67 [1] : vector<32x32xf32> to vector<32xf32>
    %233 = vector.shape_cast %232 : vector<32xf32> to vector<32x1xf32>
    %234 = tpu.reciprocal %233 {approx = true} : vector<32x1xf32> -> vector<32x1xf32>
    %235 = vector.broadcast %234 : vector<32x1xf32> to vector<32x32xf32>
    %236 = arith.mulf %231, %235 : vector<32x32xf32>
    %237 = vector.extract_strided_slice %204 {offsets = [0, 96], sizes = [32, 32], strides = [1, 1]} : vector<32x128xf32> to vector<32x32xf32>
    %cst_68 = arith.constant dense<0.000000e+00> : vector<32x32xf32>
    %238 = tpu.matmul %236, %237, %cst_68 {dimension_numbers = #tpu.dot_dimension_numbers<[1], [0], [0], [1], [0, 0, 1, 1], [], []>} : vector<32x32xf32>, vector<32x32xf32>, vector<32x32xf32> -> vector<32x32xf32>
    %239 = arith.addf %222, %238 : vector<32x32xf32>
    %240 = arith.addf %175, %239 : vector<32x32xf32>
    %c181 = arith.constant 181 : index
    %c0_69 = arith.constant 0 : index
    %241 = vector.load %arg1[%c181, %c0_69] : memref<320x32xf32, #tpu.memory_space<vmem>>, vector<1x32xf32>
    %242 = vector.broadcast %241 : vector<1x32xf32> to vector<32x32xf32>
    %243 = arith.addf %240, %242 : vector<32x32xf32>
    %c182 = arith.constant 182 : index
    %c0_70 = arith.constant 0 : index
    %244 = vector.load %arg1[%c182, %c0_70] : memref<320x32xf32, #tpu.memory_space<vmem>>, vector<1x32xf32>
    %c183 = arith.constant 183 : index
    %c0_71 = arith.constant 0 : index
    %245 = vector.load %arg1[%c183, %c0_71] : memref<320x32xf32, #tpu.memory_space<vmem>>, vector<1x32xf32>
    %cst_72 = arith.constant dense<0.000000e+00> : vector<32xf32>
    %246 = vector.multi_reduction <add>, %243, %cst_72 [1] : vector<32x32xf32> to vector<32xf32>
    %247 = vector.shape_cast %246 : vector<32xf32> to vector<32x1xf32>
    %cst_73 = arith.constant 3.200000e+01 : f32
    %248 = vector.broadcast %cst_73 : f32 to vector<32x1xf32>
    %249 = arith.divf %247, %248 : vector<32x1xf32>
    %250 = vector.broadcast %249 : vector<32x1xf32> to vector<32x32xf32>
    %251 = arith.subf %243, %250 : vector<32x32xf32>
    %252 = arith.mulf %251, %251 : vector<32x32xf32>
    %cst_74 = arith.constant dense<0.000000e+00> : vector<32xf32>
    %253 = vector.multi_reduction <add>, %252, %cst_74 [1] : vector<32x32xf32> to vector<32xf32>
    %254 = vector.shape_cast %253 : vector<32xf32> to vector<32x1xf32>
    %cst_75 = arith.constant 3.200000e+01 : f32
    %255 = vector.broadcast %cst_75 : f32 to vector<32x1xf32>
    %256 = arith.divf %254, %255 : vector<32x1xf32>
    %257 = vector.broadcast %249 : vector<32x1xf32> to vector<32x32xf32>
    %258 = arith.subf %243, %257 : vector<32x32xf32>
    %cst_76 = arith.constant 9.99999974E-6 : f32
    %259 = vector.broadcast %cst_76 : f32 to vector<32x1xf32>
    %260 = arith.addf %256, %259 : vector<32x1xf32>
    %261 = math.rsqrt %260 : vector<32x1xf32>
    %262 = vector.broadcast %261 : vector<32x1xf32> to vector<32x32xf32>
    %263 = arith.mulf %258, %262 : vector<32x32xf32>
    %264 = vector.broadcast %244 : vector<1x32xf32> to vector<32x32xf32>
    %265 = arith.mulf %263, %264 : vector<32x32xf32>
    %266 = vector.broadcast %245 : vector<1x32xf32> to vector<32x32xf32>
    %267 = arith.addf %265, %266 : vector<32x32xf32>
    %c104 = arith.constant 104 : index
    %c0_77 = arith.constant 0 : index
    %268 = vector.load %arg2[%c104, %c0_77] : memref<144x128xf32, #tpu.memory_space<vmem>>, vector<32x128xf32>
    %cst_78 = arith.constant dense<0.000000e+00> : vector<32x128xf32>
    %269 = tpu.matmul %267, %268, %cst_78 {dimension_numbers = #tpu.dot_dimension_numbers<[1], [0], [0], [1], [0, 0, 1, 1], [], []>} : vector<32x32xf32>, vector<32x128xf32>, vector<32x128xf32> -> vector<32x128xf32>
    %c137 = arith.constant 137 : index
    %c0_79 = arith.constant 0 : index
    %270 = vector.load %arg2[%c137, %c0_79] : memref<144x128xf32, #tpu.memory_space<vmem>>, vector<1x128xf32>
    %271 = vector.broadcast %270 : vector<1x128xf32> to vector<32x128xf32>
    %272 = arith.addf %269, %271 : vector<32x128xf32>
    %273 = arith.mulf %272, %272 : vector<32x128xf32>
    %274 = arith.mulf %272, %273 : vector<32x128xf32>
    %cst_80 = arith.constant 4.471500e-02 : f32
    %275 = vector.broadcast %cst_80 : f32 to vector<32x128xf32>
    %276 = arith.mulf %275, %274 : vector<32x128xf32>
    %277 = arith.addf %272, %276 : vector<32x128xf32>
    %cst_81 = arith.constant 0.797884583 : f32
    %278 = vector.broadcast %cst_81 : f32 to vector<32x128xf32>
    %279 = arith.mulf %278, %277 : vector<32x128xf32>
    %280 = math.tanh %279 : vector<32x128xf32>
    %cst_82 = arith.constant 1.000000e+00 : f32
    %281 = vector.broadcast %cst_82 : f32 to vector<32x128xf32>
    %282 = arith.addf %281, %280 : vector<32x128xf32>
    %cst_83 = arith.constant 5.000000e-01 : f32
    %283 = vector.broadcast %cst_83 : f32 to vector<32x128xf32>
    %284 = arith.mulf %283, %282 : vector<32x128xf32>
    %285 = arith.mulf %272, %284 : vector<32x128xf32>
    %c192 = arith.constant 192 : index
    %c0_84 = arith.constant 0 : index
    %286 = vector.load %arg1[%c192, %c0_84] : memref<320x32xf32, #tpu.memory_space<vmem>>, vector<128x32xf32>
    %cst_85 = arith.constant dense<0.000000e+00> : vector<32x32xf32>
    %287 = tpu.matmul %285, %286, %cst_85 {dimension_numbers = #tpu.dot_dimension_numbers<[1], [0], [0], [1], [0, 0, 1, 1], [], []>} : vector<32x128xf32>, vector<128x32xf32>, vector<32x32xf32> -> vector<32x32xf32>
    %c184 = arith.constant 184 : index
    %c0_86 = arith.constant 0 : index
    %288 = vector.load %arg1[%c184, %c0_86] : memref<320x32xf32, #tpu.memory_space<vmem>>, vector<1x32xf32>
    %289 = vector.broadcast %288 : vector<1x32xf32> to vector<32x32xf32>
    %290 = arith.addf %287, %289 : vector<32x32xf32>
    %291 = arith.addf %243, %290 : vector<32x32xf32>
    %c0_87 = arith.constant 0 : index
    %c0_88 = arith.constant 0 : index
    %292 = vector.load %arg3[%c0_87, %c0_88] : memref<32x32xf32, #tpu.memory_space<vmem>>, vector<32x32xf32>
    tpu.vector_store %arg3[%c0_87, %c0_88], %291 {strides = array<i32>} : memref<32x32xf32, #tpu.memory_space<vmem>>, vector<32x32xf32>,
    return
  }
}

</mosaic_0001>

<bundles_post_ra>
// kernel: pallas_stage.1
= control target key start
LH: loop header
LB: loop body
LE: loop exit
PB: predicated region body
PF: predicated region fallthrough
CT: control target
= control target key end

     0   :  { %v23_v3 = vlaneseq  ;;  %s3559_s0 = inlined_call_operand.vmem [shape: f32[32,32], index: 0, kind: input, shape index: {}]   ;;  %s3560_s1 = inlined_call_operand.vmem [shape: f32[320,32], index: 1, kind: input, shape index: {}]   ;;  %s3561_s2 = inlined_call_operand.vmem [shape: f32[144,128], index: 2, kind: input, shape index: {}]   ;;  %s3562_s3 = inlined_call_operand.hbm [shape: f32[32,32], index: 3, kind: output, shape index: {}]  }
   0x1   :  { %v15_v0 = vld [vmem:[%s3559_s0] sm:$0xff]  ;;  %v16_v1 = vld [vmem:[%s3559_s0 + $0x8] sm:$0xff]  ;;  %v2915_v2 = vld [vmem:[%s3559_s0 + $0x18] sm:$0xff] }
   0x2   :  { %v49_v4 = vrot.slane %v15_v0, 7  ;;  %v52_v5 = vrot.slane %v2915_v2, 7  ;;  %v62_v6 = vrot.slane %v15_v0, 1  ;;  %v63_v7 = vrot.slane %v16_v1, 1  ;;  %v17_v9 = vld [vmem:[%s3559_s0 + $0x10] sm:$0xff] }
   0x3   :  { %v2919_v8 = vshrl.u32 %v23_v3, 7  ;;  %v50_v10 = vrot.slane %v16_v1, 7  ;;  %v65_v11 = vrot.slane %v2915_v2, 1 }
   0x4   :  { %8 = vsyncpa [#allocation3], 0  ;;  %v48_v12 = vld [vmem:[%s3560_s1 + $0x20] sm:$0x7]  ;;  %v51_v13 = vrot.slane %v17_v9, 7  ;;  %v64_v14 = vrot.slane %v17_v9, 1 }
   0x5   :  { %vm28_vm0 = vcmp.eq.s32.totalorder %v2919_v8, 0  ;;  %vm53_vm1 = vcmp.lt.s32.totalorder %v2919_v8, 1  ;;  %vm66_vm2 = vcmp.lt.s32.totalorder %v2919_v8, 7  ;;  %v77_v15 = vsub.s32 0, %v2919_v8  ;;  %s2880_s8 = smov 96   ;;  %s2881_s17 = smov 32  }
   0x6   :  { %v57_v16 = vsel %vm53_vm1, %v52_v5, %v49_v4  ;;  %v69_v17 = vsel %vm66_vm2, %v62_v6, %v63_v7  ;;  %v85_v18 = vsub.s32 1, %v2919_v8  ;;  %v97_v19 = vsub.s32 2, %v2919_v8  ;;  %s2882_s18 = smov 64   ;;  %s2883_s7 = smov [#allocation2]  }
   0x7   :  { %v58_v20 = vsel %vm28_vm0, 0.0, %v57_v16  ;;  %v78_v21 = vrot.slane %v48_v12, %v77_v15  ;;  %v55_v22 = vsel %vm53_vm1, %v50_v10, %v51_v13  ;;  %v67_v23 = vsel %vm66_vm2, %v64_v14, %v65_v11  ;;  %s2261_s9 = sshll.u32 %s2883_s7, 4  ;;  %s2262_s9 = int_to_ptr.vmem [resolvable:$true] %s2261_s9 }
   0x8   :  { %v86_v24 = vrot.slane %v48_v12, %v85_v18  ;;  %v98_v25 = vrot.slane %v48_v12, %v97_v19  ;;  %v56_v26 = vsel %vm53_vm1, %v49_v4, %v50_v10  ;;  %v68_v27 = vsel %vm66_vm2, %v63_v7, %v64_v14  ;;  %p2862_p1 = scmp.lt.s32.totalorder %s2262_s9, %s2262_s9 }
   0x9   :  { %v79_v28 = vmul.f32 %v78_v21, %v58_v20  ;;  %v81_v29 = vmul.f32 %v78_v21, %v55_v22  ;;  %v80_v30 = vmul.f32 %v78_v21, %v56_v26  ;;  %v2955_v31 = vadd.s32 24, %v2919_v8  ;;  %v185_v22 = vld [vmem:[%s3561_s2 + $0x10] sm:$0xff] }
   0xa   :  { %v87_v32 = vmul.f32 %v86_v24, %v15_v0  ;;  %v99_v33 = vmul.f32 %v98_v25, %v69_v17  ;;  %v89_v34 = vmul.f32 %v86_v24, %v17_v9  ;;  %v101_v35 = vmul.f32 %v98_v25, %v67_v23  ;;  %v184_v23 = vld [vmem:[%s3561_s2 + $0x8] sm:$0xff] }
   0xb   :  { %v88_v36 = vmul.f32 %v86_v24, %v16_v1  ;;  %v100_v37 = vmul.f32 %v98_v25, %v68_v27  ;;  %vm35_vm3 = vcmp.eq.s32.totalorder %v2955_v31, 31  ;;  %v54_v38 = vsel %vm53_vm1, %v51_v13, %v52_v5 }
   0xc   :  { %v91_v39 = vadd.f32 %v87_v32, %v79_v28  ;;  %v93_v40 = vadd.f32 %v89_v34, %v81_v29  ;;  %v70_v41 = vsel %vm66_vm2, %v65_v11, %v62_v6  ;;  %v82_v42 = vmul.f32 %v78_v21, %v54_v38  ;;  %v186_v21 = vld [vmem:[%s3561_s2 + $0x18] sm:$0xff] }
   0xd   :  { %v92_v43 = vadd.f32 %v88_v36, %v80_v30  ;;  %v74_v44 = vsel %vm35_vm3, 0.0, %v70_v41  ;;  %v90_v45 = vmul.f32 %v86_v24, %v2915_v2  ;;  %vm113_vm4 = vcmask 261120   ;;  %2490 = vmatprep.subr.mxu0 %v186_v21  ;;  %v183_v24 = vld [vmem:[%s3561_s2] sm:$0xff] }
   0xe   :  { %v103_v46 = vadd.f32 %v99_v33, %v91_v39  ;;  %v105_v47 = vadd.f32 %v101_v35, %v93_v40  ;;  %v102_v48 = vmul.f32 %v98_v25, %v74_v44  ;;  %2491 = vmatpush3.msra.mxu0 %v186_v21  ;;  %v2274_v39 = vld [vmem:[%s3560_s1 + $0x23] ss:$0 sm:$0xff]  ;;  %v2275_v41 = vld [vmem:[%s3560_s1 + $0x24] ss:$0 sm:$0xff] }
   0xf   :  { %v104_v49 = vadd.f32 %v100_v37, %v92_v43  ;;  %v94_v50 = vadd.f32 %v90_v45, %v82_v42  ;;  %2492 = vmatprep.subr.mxu0 %v185_v22 }
  0x10   :  { %v2965_v51 = vadd.f32 %v103_v46, %v15_v0  ;;  %v2967_v52 = vadd.f32 %v105_v47, %v17_v9  ;;  %2493 = vmatpush3.msra.mxu0 %v185_v22 }
  0x11   :  { %v2969_v53 = vadd.f32 %v104_v49, %v16_v1  ;;  %v106_v54 = vadd.f32 %v102_v48, %v94_v50  ;;  %2494 = vmatprep.subr.mxu0 %v184_v23 }
  0x12   :  { %v114_v55 = vsel %vm113_vm4, %v2965_v51, 0.0  ;;  %v120_v56 = vsel %vm113_vm4, %v2967_v52, 0.0  ;;  %2495 = vmatpush3.msra.mxu0 %v184_v23 }
  0x13   :  { %115 = vadd.xlane.f32.xlu0 %v114_v55  ;;  %121 = vadd.xlane.f32.xlu1 %v120_v56  ;;  %v2976_v57 = vadd.f32 %v106_v54, %v2915_v2  ;;  %v117_v58 = vsel %vm113_vm4, %v2969_v53, 0.0 }
  0x14   :  { %2496 = vmatprep.subr.mxu0 %v183_v24 }
  0x15   :  { %v123_v59 = vsel %vm113_vm4, %v2976_v57, 0.0  ;;  %2497 = vmatpush3.msra.mxu0 %v183_v24 }
  0x17   :  { %118 = vadd.xlane.f32.xlu0 %v117_v58  ;;  %124 = vadd.xlane.f32.xlu1 %v123_v59 }
  0x9c   :  { %v116_v60 = vpop.xlane.xlu0 %115  ;;  %v122_v61 = vpop.xlane.xlu1 %121 }
  0x9d   :  { %v127_v62 = vmul.f32 0.03125, %v116_v60  ;;  %v129_v63 = vmul.f32 0.03125, %v122_v61  ;;  %v37_v60 = vand.u32 127, %v23_v3 }
  0x9f   :  { %v131_v0 = vsub.f32 %v2965_v51, %v127_v62  ;;  %v133_v1 = vsub.f32 %v2967_v52, %v129_v63  ;;  %vm39_vm5 = vcmp.lt.s32.totalorder %v37_v60, 16  ;;  %v2276_v62 = vld [vmem:[%s3561_s2 + $0x40] ss:$0 sm:$0xff]  ;;  %vm43_vm6 = vcmp.ge.s32.totalorder %v37_v60, 16 }
  0xa0   :  { %v119_v4 = vpop.xlane.xlu0 %118  ;;  %v125_v5 = vpop.xlane.xlu1 %124  ;;  %vm44_vm7 = vcmp.lt.s32.totalorder %v37_v60, 32 }
  0xa1   :  { %v128_v2 = vmul.f32 0.03125, %v119_v4  ;;  %v130_v6 = vmul.f32 0.03125, %v125_v5  ;;  %v135_v7 = vmul.f32 %v131_v0, %v131_v0  ;;  %v137_v9 = vmul.f32 %v133_v1, %v133_v1  ;;  %vm45_vm8 = vmand %vm43_vm6, %vm44_vm7 }
  0xa2   :  { %v2879_v4 = vmov 0.0  }
  0xa3   :  { %v132_v10 = vsub.f32 %v2969_v53, %v128_v2  ;;  %v134_v11 = vsub.f32 %v2976_v57, %v130_v6  ;;  %v139_v12 = vsel %vm113_vm4, %v135_v7, 0.0  ;;  %v145_v13 = vsel %vm113_vm4, %v137_v9, 0.0 }
  0xa4   :  { %140 = vadd.xlane.f32.xlu0 %v139_v12  ;;  %v3018_v5 = vsel %vm39_vm5, 1.0, %v2879_v4 }
  0xa5   :  { %v136_v14 = vmul.f32 %v132_v10, %v132_v10  ;;  %v138_v16 = vmul.f32 %v134_v11, %v134_v11 }
  0xa7   :  { %v142_v17 = vsel %vm113_vm4, %v136_v14, 0.0  ;;  %v148_v20 = vsel %vm113_vm4, %v138_v16, 0.0 }
  0xa8   :  { %146 = vadd.xlane.f32.xlu0 %v145_v13  ;;  %143 = vadd.xlane.f32.xlu1 %v142_v17  ;;  %v3053_v17 = vsel %vm45_vm8, 1.0, %v2879_v4 }
  0xac   :  { %149 = vadd.xlane.f32.xlu1 %v148_v20 }
 0x12d   :  { %v141_v25 = vpop.xlane.xlu0 %140 }
 0x12e   :  { %v151_v26 = vmul.f32 0.03125, %v141_v25  ;;  %v20_v25 = vld [vmem:[%s3560_s1 + $0x8] sm:$0xff] }
 0x130   :  { %v155_v27 = vadd.f32 1e-05, %v151_v26 }
 0x131   :  { %v144_v28 = vpop.xlane.xlu1 %143  ;;  %v147_v29 = vpop.xlane.xlu0 %146 }
 0x132   :  { %2741 = vrsqrt.f32 %v155_v27  ;;  %v152_v30 = vmul.f32 0.03125, %v144_v28  ;;  %v153_v32 = vmul.f32 0.03125, %v147_v29  ;;  %v19_v27 = vld [vmem:[%s3560_s1] sm:$0xff] }
 0x134   :  { %v156_v33 = vadd.f32 1e-05, %v152_v30  ;;  %v157_v34 = vadd.f32 1e-05, %v153_v32 }
 0x135   :  { %v150_v35 = vpop.xlane.xlu1 %149 }
 0x136   :  { %2743 = vrsqrt.f32 %v156_v33  ;;  %v154_v36 = vmul.f32 0.03125, %v150_v35 }
 0x137   :  { %2745 = vrsqrt.f32 %v157_v34  ;;  %v21_v34 = vld [vmem:[%s3560_s1 + $0x10] sm:$0xff] }
 0x138   :  { %v158_v37 = vadd.f32 1e-05, %v154_v36 }
 0x13a   :  { %2747 = vrsqrt.f32 %v158_v37 }
 0x13f   :  { %v2742_v38 = vpop.eup %2741 }
 0x140   :  { %v163_v40 = vmul.f32 %v2742_v38, %v131_v0 }
 0x142   :  { %v171_v42 = vmul.f32 %v2274_v39, %v163_v40 }
 0x143   :  { %v2744_v43 = vpop.eup %2743 }
 0x144   :  { %v2746_v44 = vpop.eup %2745  ;;  %v179_v45 = vadd.f32 %v2275_v41, %v171_v42  ;;  %v164_v46 = vmul.f32 %v2744_v43, %v132_v10 }
 0x145   :  { %v165_v47 = vmul.f32 %v2746_v44, %v133_v1 }
 0x146   :  { %2498 = vmatprep.mubr.msk.f32.mxu0 %vm113_vm4, %v179_v45  ;;  %v172_v48 = vmul.f32 %v2274_v39, %v164_v46 }
 0x147   :  { %v2748_v49 = vpop.eup %2747  ;;  %v173_v50 = vmul.f32 %v2274_v39, %v165_v47 }
 0x148   :  { %v180_v54 = vadd.f32 %v2275_v41, %v172_v48  ;;  %v166_v55 = vmul.f32 %v2748_v49, %v134_v11 }
 0x149   :  { %v181_v56 = vadd.f32 %v2275_v41, %v173_v50 }
 0x14a   :  { %2499 = vmatmul.mubr.msk.f32.vlgmr.msra.gmra.mxu0 %vm113_vm4, %v180_v54  ;;  %v174_v58 = vmul.f32 %v2274_v39, %v166_v55  ;;  %v22_v39 = vld [vmem:[%s3560_s1 + $0x18] sm:$0xff] }
 0x14b   :  { %2501 = vmatprep.mubr.msk.f32.mxu0 %vm113_vm4, %v181_v56 }
 0x14c   :  { %v182_v59 = vadd.f32 %v2275_v41, %v174_v58 }
 0x14e   :  { %2502 = vmatmul.mubr.msk.f32.gmra.mxu0 %vm113_vm4, %v182_v59 }
 0x20a   :  { %v2500_v61 = vpop.f32.mrf.mxu0 }
 0x20b   :  { %v3031_v9 = vadd.f32 %v2500_v61, %v2276_v62 }
 0x20c   :  { %v270_v63 = vpop.f32.mrf.mxu0 }
 0x20d   :  { %v3016_v0 = vadd.f32 %v2276_v62, %v270_v63  ;;  %v290_v14 = vmul.f32 %v3018_v5, %v3031_v9  ;;  %v455_v22 = vmul.f32 %v3053_v17, %v3031_v9 }
 0x20e   :  { %v2503_v1 = vpop.f32.mrf.mxu0 }
 0x20f   :  { %v3020_v2 = vadd.f32 %v2503_v1, %v2276_v62  ;;  %v289_v6 = vmul.f32 %v3018_v5, %v3016_v0  ;;  %v454_v21 = vmul.f32 %v3053_v17, %v3016_v0 }
 0x210   :  { %v280_v7 = vpop.f32.mrf.mxu0 }
 0x211   :  { %v3024_v3 = vadd.f32 %v2276_v62, %v280_v7  ;;  %2512 = vmatprep.mubr.msk.f32.mxu1 %vm113_vm4, %v289_v6  ;;  %303 = vrot.lane.b32.xlu0 %v3020_v2, %s2880_s8  ;;  %v292_v20 = vmul.f32 %v3018_v5, %v3020_v2  ;;  %v457_v24 = vmul.f32 %v3053_v17, %v3020_v2 }
 0x213   :  { %301 = vrot.lane.b32.xlu1 %v3024_v3, %s2880_s8  ;;  %v291_v16 = vmul.f32 %v3018_v5, %v3024_v3  ;;  %v456_v23 = vmul.f32 %v3053_v17, %v3024_v3 }
 0x217   :  { %299 = vrot.lane.b32.xlu1 %v3031_v9, %s2880_s8 }
 0x21b   :  { %297 = vrot.lane.b32.xlu1 %v3016_v0, %s2880_s8 }
 0x283   :  { %v304_v10 = vpop.permute.xlu0 %303 }
 0x284   :  { %2504 = vmatprep.subr.msk.mxu1 %vm113_vm4, %v304_v10 }
 0x285   :  { %2505 = vmatpush3.xpose.msk.msra.mxu1 %vm113_vm4, %v304_v10  ;;  %v302_v11 = vpop.permute.xlu1 %301 }
 0x286   :  { %2506 = vmatprep.subr.msk.mxu1 %vm113_vm4, %v302_v11 }
 0x289   :  { %2507 = vmatpush3.xpose.msk.msra.mxu1 %vm113_vm4, %v302_v11  ;;  %v300_v12 = vpop.permute.xlu1 %299 }
 0x28a   :  { %2508 = vmatprep.subr.msk.mxu1 %vm113_vm4, %v300_v12 }
 0x28d   :  { %2509 = vmatpush3.xpose.msk.msra.mxu1 %vm113_vm4, %v300_v12  ;;  %v298_v13 = vpop.permute.xlu1 %297 }
 0x28e   :  { %2510 = vmatprep.subr.msk.mxu1 %vm113_vm4, %v298_v13 }
 0x291   :  { %2511 = vmatpush3.xpose.msk.msra.mxu1 %vm113_vm4, %v298_v13 }
 0x292   :  { %2518 = vmatprep.subr.msk.mxu1 %vm113_vm4, %v304_v10 }
 0x294   :  { %2513 = vmatmul.mubr.msk.f32.vlgmr.msra.gmra.mxu1 %vm113_vm4, %v290_v14 }
 0x295   :  { %2515 = vmatprep.mubr.msk.f32.mxu1 %vm113_vm4, %v291_v16  ;;  %2519 = vmatpush3.xpose.msk.msra.mxu1 %vm113_vm4, %v304_v10 }
 0x296   :  { %2520 = vmatprep.subr.msk.mxu1 %vm113_vm4, %v302_v11 }
 0x298   :  { %2516 = vmatmul.mubr.msk.f32.gmra.mxu1 %vm113_vm4, %v292_v20 }
 0x299   :  { %2521 = vmatpush3.xpose.msk.msra.mxu1 %vm113_vm4, %v302_v11  ;;  %2526 = vmatprep.mubr.msk.f32.mxu1 %vm113_vm4, %v454_v21 }
 0x29a   :  { %2522 = vmatprep.subr.msk.mxu1 %vm113_vm4, %v300_v12 }
 0x29d   :  { %2523 = vmatpush3.xpose.msk.msra.mxu1 %vm113_vm4, %v300_v12 }
 0x29e   :  { %2524 = vmatprep.subr.msk.mxu1 %vm113_vm4, %v298_v13 }
 0x2a1   :  { %2525 = vmatpush3.xpose.msk.msra.mxu1 %vm113_vm4, %v298_v13 }
 0x2a4   :  { %2527 = vmatmul.mubr.msk.f32.vlgmr.msra.gmra.mxu1 %vm113_vm4, %v455_v22 }
 0x2a5   :  { %2529 = vmatprep.mubr.msk.f32.mxu1 %vm113_vm4, %v456_v23 }
 0x2a8   :  { %2530 = vmatmul.mubr.msk.f32.gmra.mxu1 %vm113_vm4, %v457_v24 }
 0x354   :  { %v2514_v26 = vpop.f32.mrf.mxu1 }
 0x355   :  { %v397_v28 = vadd.f32 %v2514_v26, %v20_v25 }
 0x356   :  { %v391_v29 = vpop.f32.mrf.mxu1 }
 0x357   :  { %v392_v30 = vadd.f32 %v391_v29, %v19_v27  ;;  %v413_v32 = vsel %vm113_vm4, %v397_v28, -inf }
 0x358   :  { %414 = vmax.xlane.f32.xlu0 %v413_v32  ;;  %v2517_v33 = vpop.f32.mrf.mxu1 }
 0x359   :  { %v410_v37 = vsel %vm113_vm4, %v392_v30, -inf  ;;  %v407_v43 = vadd.f32 %v2517_v33, %v22_v39 }
 0x35a   :  { %v401_v35 = vpop.f32.mrf.mxu1 }
 0x35b   :  { %v402_v36 = vadd.f32 %v401_v35, %v21_v34  ;;  %v419_v50 = vsel %vm113_vm4, %v407_v43, -inf }
 0x35c   :  { %411 = vmax.xlane.f32.xlu0 %v410_v37 }
 0x35d   :  { %v416_v38 = vsel %vm113_vm4, %v402_v36, -inf }
 0x360   :  { %417 = vmax.xlane.f32.xlu0 %v416_v38 }
 0x364   :  { %v2528_v40 = vpop.f32.mrf.mxu1 }
 0x365   :  { %v542_v41 = vadd.f32 %v2528_v40, %v20_v25 }
 0x366   :  { %v536_v42 = vpop.f32.mrf.mxu1 }
 0x367   :  { %v537_v44 = vadd.f32 %v536_v42, %v19_v27  ;;  %v558_v45 = vsel %vm113_vm4, %v542_v41, -inf }
 0x368   :  { %v2531_v46 = vpop.f32.mrf.mxu1  ;;  %559 = vmax.xlane.f32.xlu0 %v558_v45 }
 0x369   :  { %v552_v47 = vadd.f32 %v2531_v46, %v22_v39  ;;  %v555_v48 = vsel %vm113_vm4, %v537_v44, -inf }
 0x36a   :  { %v546_v49 = vpop.f32.mrf.mxu1  ;;  %556 = vmax.xlane.f32.xlu1 %v555_v48 }
 0x36b   :  { %v547_v54 = vadd.f32 %v546_v49, %v21_v34  ;;  %v564_v55 = vsel %vm113_vm4, %v552_v47, -inf }
 0x36c   :  { %420 = vmax.xlane.f32.xlu0 %v419_v50 }
 0x36d   :  { %v561_v56 = vsel %vm113_vm4, %v547_v54, -inf }
 0x36e   :  { %565 = vmax.xlane.f32.xlu1 %v564_v55 }
 0x372   :  { %562 = vmax.xlane.f32.xlu1 %v561_v56 }
 0x382   :  { %605 = vrot.lane.b32.xlu0 %v3020_v2, %s2881_s17 }
 0x383   :  { %714 = vrot.lane.b32.xlu1 %v3020_v2, %s2882_s18 }
 0x386   :  { %601 = vrot.lane.b32.xlu0 %v3031_v9, %s2881_s17 }
 0x387   :  { %603 = vrot.lane.b32.xlu1 %v3024_v3, %s2881_s17 }
 0x38b   :  { %712 = vrot.lane.b32.xlu1 %v3024_v3, %s2882_s18 }
 0x38f   :  { %710 = vrot.lane.b32.xlu1 %v3031_v9, %s2882_s18 }
 0x3e1   :  { %v415_v58 = vpop.xlane.xlu0 %414 }
 0x3e2   :  { %v423_v59 = vsub.f32 %v397_v28, %v415_v58 }
 0x3e4   :  { %v428_v60 = vmul.f32 1.442695, %v423_v59 }
 0x3e5   :  { %v412_v61 = vpop.xlane.xlu0 %411 }
 0x3e6   :  { %2749 = vpow2.f32 %v428_v60  ;;  %v422_v62 = vsub.f32 %v392_v30, %v412_v61 }
 0x3e8   :  { %v426_v63 = vmul.f32 1.442695, %v422_v62 }
 0x3e9   :  { %v418_v1 = vpop.xlane.xlu0 %417 }
 0x3ea   :  { %2751 = vpow2.f32 %v426_v63  ;;  %v424_v9 = vsub.f32 %v402_v36, %v418_v1 }
 0x3ec   :  { %v430_v24 = vmul.f32 1.442695, %v424_v9 }
 0x3f1   :  { %v560_v4 = vpop.xlane.xlu0 %559 }
 0x3f2   :  { %v568_v2 = vsub.f32 %v542_v41, %v560_v4 }
 0x3f3   :  { %v3108_v6 = vpop.eup %2749  ;;  %v557_v7 = vpop.xlane.xlu1 %556 }
 0x3f4   :  { %v573_v10 = vmul.f32 1.442695, %v568_v2  ;;  %v567_v11 = vsub.f32 %v537_v44, %v557_v7  ;;  %v437_v3 = vsel %vm113_vm4, %v3108_v6, 0.0 }
 0x3f5   :  { %438 = vadd.xlane.f32.xlu0 %v437_v3  ;;  %v421_v12 = vpop.xlane.xlu0 %420 }
 0x3f6   :  { %2753 = vpow2.f32 %v573_v10  ;;  %v571_v13 = vmul.f32 1.442695, %v567_v11  ;;  %v425_v14 = vsub.f32 %v407_v43, %v421_v12 }
 0x3f7   :  { %v2752_v16 = vpop.eup %2751  ;;  %v566_v20 = vpop.xlane.xlu1 %565 }
 0x3f8   :  { %2755 = vpow2.f32 %v571_v13  ;;  %v432_v21 = vmul.f32 1.442695, %v425_v14  ;;  %v570_v22 = vsub.f32 %v552_v47, %v566_v20  ;;  %v434_v23 = vsel %vm113_vm4, %v2752_v16, 0.0 }
 0x3f9   :  { %435 = vadd.xlane.f32.xlu0 %v434_v23  ;;  %v606_v25 = vpop.permute.xlu0 %605 }
 0x3fa   :  { %2757 = vpow2.f32 %v432_v21  ;;  %v577_v26 = vmul.f32 1.442695, %v570_v22  ;;  %2532 = vmatprep.subr.mxu1 %v606_v25 }
 0x3fb   :  { %v563_v27 = vpop.xlane.xlu1 %562  ;;  %2533 = vmatpush3.msra.mxu1 %v606_v25 }
 0x3fc   :  { %2759 = vpow2.f32 %v577_v26  ;;  %v569_v28 = vsub.f32 %v547_v54, %v563_v27 }
 0x3fd   :  { %2761 = vpow2.f32 %v430_v24  ;;  %v602_v36 = vpop.permute.xlu0 %601  ;;  %v2305_v24 = vld [vmem:[%s3560_s1 + $0x25] ss:$0 sm:$0xff] }
 0x3fe   :  { %v575_v29 = vmul.f32 1.442695, %v569_v28 }
 0x3ff   :  { %v715_v30 = vpop.permute.xlu1 %714 }
 0x400   :  { %2763 = vpow2.f32 %v575_v29  ;;  %2546 = vmatprep.subr.mxu0 %v715_v30 }
 0x401   :  { %2547 = vmatpush3.msra.mxu0 %v715_v30 }
 0x403   :  { %v3113_v32 = vpop.eup %2753  ;;  %v604_v33 = vpop.permute.xlu1 %603 }
 0x404   :  { %2534 = vmatprep.subr.mxu1 %v604_v33  ;;  %v582_v34 = vsel %vm113_vm4, %v3113_v32, 0.0 }
 0x405   :  { %v2756_v35 = vpop.eup %2755  ;;  %583 = vadd.xlane.f32.xlu1 %v582_v34  ;;  %2535 = vmatpush3.msra.mxu1 %v604_v33 }
 0x406   :  { %2536 = vmatprep.subr.mxu1 %v602_v36  ;;  %v579_v39 = vsel %vm113_vm4, %v2756_v35, 0.0 }
 0x407   :  { %v2758_v37 = vpop.eup %2757  ;;  %v713_v38 = vpop.permute.xlu1 %712  ;;  %2537 = vmatpush3.msra.mxu1 %v602_v36 }
 0x408   :  { %2548 = vmatprep.subr.mxu0 %v713_v38  ;;  %v443_v40 = vsel %vm113_vm4, %v2758_v37, 0.0 }
 0x409   :  { %v2760_v41 = vpop.eup %2759  ;;  %2549 = vmatpush3.msra.mxu0 %v713_v38  ;;  %580 = vadd.xlane.f32.xlu1 %v579_v39 }
 0x40a   :  { %v2762_v42 = vpop.eup %2761  ;;  %444 = vadd.xlane.f32.xlu0 %v443_v40  ;;  %v588_v44 = vsel %vm113_vm4, %v2760_v41, 0.0 }
 0x40b   :  { %v711_v43 = vpop.permute.xlu1 %710  ;;  %v440_v46 = vsel %vm113_vm4, %v2762_v42, 0.0 }
 0x40c   :  { %2550 = vmatprep.subr.mxu0 %v711_v43 }
 0x40d   :  { %v2764_v45 = vpop.eup %2763  ;;  %2551 = vmatpush3.msra.mxu0 %v711_v43  ;;  %589 = vadd.xlane.f32.xlu1 %v588_v44 }
 0x40e   :  { %441 = vadd.xlane.f32.xlu0 %v440_v46  ;;  %v585_v47 = vsel %vm113_vm4, %v2764_v45, 0.0 }
 0x411   :  { %586 = vadd.xlane.f32.xlu1 %v585_v47 }
 0x422   :  { %708 = vrot.lane.b32.xlu1 %v3016_v0, %s2882_s18 }
 0x424   :  { %599 = vrot.lane.b32.xlu0 %v3016_v0, %s2881_s17 }
 0x47e   :  { %v439_v48 = vpop.xlane.xlu0 %438 }
 0x482   :  { %v436_v49 = vpop.xlane.xlu0 %435 }
 0x483   :  { %2765 = vrcp.f32 %v436_v49 }
 0x484   :  { %2767 = vrcp.f32 %v439_v48 }
 0x48e   :  { %v584_v50 = vpop.xlane.xlu1 %583 }
 0x48f   :  { %2769 = vrcp.f32 %v584_v50 }
 0x490   :  { %v2766_v54 = vpop.eup %2765 }
 0x491   :  { %v450_v55 = vmul.f32 %v2766_v54, %v2752_v16  ;;  %v2768_v62 = vpop.eup %2767 }
 0x492   :  { %v581_v56 = vpop.xlane.xlu1 %580  ;;  %v451_v4 = vmul.f32 %v2768_v62, %v3108_v6 }
 0x493   :  { %2771 = vrcp.f32 %v581_v56  ;;  %v445_v58 = vpop.xlane.xlu0 %444  ;;  %2554 = vmatprep.mubr.msk.f32.mxu0 %vm113_vm4, %v450_v55 }
 0x494   :  { %2773 = vrcp.f32 %v445_v58 }
 0x496   :  { %v590_v59 = vpop.xlane.xlu1 %589 }
 0x497   :  { %v442_v60 = vpop.xlane.xlu0 %441 }
 0x498   :  { %2775 = vrcp.f32 %v442_v60 }
 0x499   :  { %2777 = vrcp.f32 %v590_v59 }
 0x49a   :  { %v587_v61 = vpop.xlane.xlu1 %586 }
 0x49b   :  { %2779 = vrcp.f32 %v587_v61  ;;  %v600_v0 = vpop.permute.xlu0 %599 }
 0x49c   :  { %2538 = vmatprep.subr.mxu1 %v600_v0  ;;  %v2770_v1 = vpop.eup %2769 }
 0x49d   :  { %2539 = vmatpush3.msra.mxu1 %v600_v0  ;;  %v596_v10 = vmul.f32 %v2770_v1, %v3113_v32 }
 0x49e   :  { %v709_v63 = vpop.permute.xlu1 %708 }
 0x49f   :  { %2552 = vmatprep.subr.mxu0 %v709_v63 }
 0x4a0   :  { %v2772_v2 = vpop.eup %2771  ;;  %2553 = vmatpush3.msra.mxu0 %v709_v63 }
 0x4a1   :  { %2555 = vmatmul.mubr.msk.f32.vlgmr.msra.gmra.mxu0 %vm113_vm4, %v451_v4  ;;  %v595_v7 = vmul.f32 %v2772_v2, %v2756_v35  ;;  %v2774_v11 = vpop.eup %2773  ;;  %v903_v4 = vld [vmem:[%s3561_s2 + $0x38] sm:$0xff]  ;;  %v902_v2 = vld [vmem:[%s3561_s2 + $0x30] sm:$0xff] }
 0x4a2   :  { %v453_v13 = vmul.f32 %v2774_v11, %v2758_v37  ;;  %2560 = vmatprep.subr.mxu1 %v903_v4 }
 0x4a3   :  { %2540 = vmatprep.mubr.msk.f32.mxu1 %vm113_vm4, %v595_v7  ;;  %v901_v7 = vld [vmem:[%s3561_s2 + $0x28] sm:$0xff] }
 0x4a4   :  { %2541 = vmatmul.mubr.msk.f32.vlgmr.msra.gmra.mxu1 %vm113_vm4, %v596_v10  ;;  %v900_v10 = vld [vmem:[%s3561_s2 + $0x20] sm:$0xff] }
 0x4a5   :  { %v2776_v3 = vpop.eup %2775  ;;  %2561 = vmatpush3.msra.mxu1 %v903_v4 }
 0x4a6   :  { %v452_v9 = vmul.f32 %v2776_v3, %v2762_v42  ;;  %v2778_v12 = vpop.eup %2777  ;;  %2562 = vmatprep.subr.mxu1 %v902_v2 }
 0x4a7   :  { %v598_v16 = vmul.f32 %v2778_v12, %v2760_v41  ;;  %2563 = vmatpush3.msra.mxu1 %v902_v2 }
 0x4a8   :  { %v2780_v14 = vpop.eup %2779  ;;  %2557 = vmatprep.mubr.msk.f32.mxu0 %vm113_vm4, %v452_v9  ;;  %2564 = vmatprep.subr.mxu1 %v901_v7 }
 0x4a9   :  { %2558 = vmatmul.mubr.msk.f32.gmra.mxu0 %vm113_vm4, %v453_v13  ;;  %v597_v6 = vmul.f32 %v2780_v14, %v2764_v45  ;;  %2565 = vmatpush3.msra.mxu1 %v901_v7 }
 0x4aa   :  { %2566 = vmatprep.subr.mxu1 %v900_v10 }
 0x4ab   :  { %2543 = vmatprep.mubr.msk.f32.mxu1 %vm113_vm4, %v597_v6  ;;  %2567 = vmatpush3.msra.mxu1 %v900_v10 }
 0x4ac   :  { %2544 = vmatmul.mubr.msk.f32.gmra.mxu1 %vm113_vm4, %v598_v16 }
 0x561   :  { %v2556_v20 = vpop.f32.mrf.mxu0 }
 0x563   :  { %v798_v23 = vpop.f32.mrf.mxu0 }
 0x564   :  { %v2542_v21 = vpop.f32.mrf.mxu1 }
 0x565   :  { %v804_v22 = vadd.f32 %v2556_v20, %v2542_v21 }
 0x566   :  { %v689_v25 = vpop.f32.mrf.mxu1 }
 0x567   :  { %v818_v26 = vadd.f32 %v804_v22, %v2969_v53  ;;  %v799_v27 = vadd.f32 %v798_v23, %v689_v25 }
 0x569   :  { %v3140_v28 = vadd.f32 %v2305_v24, %v818_v26  ;;  %v817_v29 = vadd.f32 %v799_v27, %v2965_v51  ;;  %v2559_v30 = vpop.f32.mrf.mxu0  ;;  %v2306_v26 = vld [vmem:[%s3560_s1 + $0x26] ss:$0 sm:$0xff] }
 0x56b   :  { %v3143_v32 = vadd.f32 %v2305_v24, %v817_v29  ;;  %v835_v33 = vsel %vm113_vm4, %v3140_v28, 0.0  ;;  %v808_v37 = vpop.f32.mrf.mxu0 }
 0x56c   :  { %836 = vadd.xlane.f32.xlu1 %v835_v33  ;;  %v2545_v34 = vpop.f32.mrf.mxu1  ;;  %v2307_v33 = vld [vmem:[%s3560_s1 + $0x27] ss:$0 sm:$0xff] }
 0x56d   :  { %v814_v35 = vadd.f32 %v2559_v30, %v2545_v34  ;;  %v832_v36 = vsel %vm113_vm4, %v3143_v32, 0.0 }
 0x56e   :  { %833 = vadd.xlane.f32.xlu0 %v832_v36  ;;  %v699_v53 = vpop.f32.mrf.mxu1 }
 0x56f   :  { %v809_v38 = vadd.f32 %v808_v37, %v699_v53  ;;  %v820_v39 = vadd.f32 %v814_v35, %v2976_v57 }
 0x571   :  { %v819_v51 = vadd.f32 %v809_v38, %v2967_v52  ;;  %v3153_v41 = vadd.f32 %v2305_v24, %v820_v39 }
 0x573   :  { %v3151_v40 = vadd.f32 %v2305_v24, %v819_v51  ;;  %v841_v43 = vsel %vm113_vm4, %v3153_v41, 0.0 }
 0x575   :  { %v838_v42 = vsel %vm113_vm4, %v3151_v40, 0.0 }
 0x576   :  { %839 = vadd.xlane.f32.xlu0 %v838_v42 }
 0x57a   :  { %842 = vadd.xlane.f32.xlu0 %v841_v43 }
 0x5f5   :  { %v837_v44 = vpop.xlane.xlu1 %836 }
 0x5f6   :  { %v845_v45 = vmul.f32 0.03125, %v837_v44 }
 0x5f7   :  { %v834_v46 = vpop.xlane.xlu0 %833 }
 0x5f8   :  { %v849_v47 = vsub.f32 %v3140_v28, %v845_v45  ;;  %v844_v57 = vmul.f32 0.03125, %v834_v46  ;;  %v1057_v45 = vld [vmem:[%s3560_s1 + $0xa8] sm:$0xff]  ;;  %v1056_v46 = vld [vmem:[%s3560_s1 + $0xa0] sm:$0xff] }
 0x5f9   :  { %2574 = vmatprep.subr.mxu0 %v1057_v45 }
 0x5fa   :  { %v848_v52 = vsub.f32 %v3143_v32, %v844_v57  ;;  %v853_v48 = vmul.f32 %v849_v47, %v849_v47  ;;  %2575 = vmatpush3.msra.mxu0 %v1057_v45  ;;  %v1054_v57 = vld [vmem:[%s3560_s1 + $0x90] sm:$0xff] }
 0x5fb   :  { %2576 = vmatprep.subr.mxu0 %v1056_v46 }
 0x5fc   :  { %v859_v49 = vsel %vm113_vm4, %v853_v48, 0.0  ;;  %v852_v50 = vmul.f32 %v848_v52, %v848_v52  ;;  %2577 = vmatpush3.msra.mxu0 %v1056_v46  ;;  %v1052_v48 = vld [vmem:[%s3560_s1 + $0x80] sm:$0xff] }
 0x5fd   :  { %860 = vadd.xlane.f32.xlu1 %v859_v49  ;;  %v1051_v49 = vld [vmem:[%s3560_s1 + $0x78] sm:$0xff] }
 0x5fe   :  { %v856_v54 = vsel %vm113_vm4, %v852_v50, 0.0  ;;  %v1050_v50 = vld [vmem:[%s3560_s1 + $0x70] sm:$0xff] }
 0x5ff   :  { %857 = vadd.xlane.f32.xlu0 %v856_v54  ;;  %v840_v55 = vpop.xlane.xlu0 %839  ;;  %v1049_v54 = vld [vmem:[%s3560_s1 + $0x68] sm:$0xff] }
 0x600   :  { %v846_v56 = vmul.f32 0.03125, %v840_v55  ;;  %v1048_v55 = vld [vmem:[%s3560_s1 + $0x60] sm:$0xff] }
 0x602   :  { %v850_v58 = vsub.f32 %v3151_v40, %v846_v56  ;;  %v1047_v56 = vld [vmem:[%s3560_s1 + $0x58] sm:$0xff] }
 0x603   :  { %v843_v59 = vpop.xlane.xlu0 %842 }
 0x604   :  { %v847_v60 = vmul.f32 0.03125, %v843_v59  ;;  %v854_v61 = vmul.f32 %v850_v58, %v850_v58  ;;  %v1045_v59 = vld [vmem:[%s3560_s1 + $0x48] sm:$0xff] }
 0x606   :  { %v851_v0 = vsub.f32 %v3153_v41, %v847_v60  ;;  %v862_v62 = vsel %vm113_vm4, %v854_v61, 0.0  ;;  %v1044_v60 = vld [vmem:[%s3560_s1 + $0x40] sm:$0xff]  ;;  %v1043_v61 = vld [vmem:[%s3560_s1 + $0x38] sm:$0xff] }
 0x607   :  { %863 = vadd.xlane.f32.xlu0 %v862_v62  ;;  %v2308_v62 = vld [vmem:[%s3561_s2 + $0x41] ss:$0 sm:$0xff] }
 0x608   :  { %v855_v63 = vmul.f32 %v851_v0, %v851_v0 }
 0x60a   :  { %v865_v1 = vsel %vm113_vm4, %v855_v63, 0.0 }
 0x60b   :  { %866 = vadd.xlane.f32.xlu1 %v865_v1 }
 0x686   :  { %v861_v11 = vpop.xlane.xlu1 %860 }
 0x687   :  { %v869_v3 = vmul.f32 0.03125, %v861_v11 }
 0x688   :  { %v858_v9 = vpop.xlane.xlu0 %857 }
 0x689   :  { %v873_v12 = vadd.f32 1e-05, %v869_v3  ;;  %v868_v13 = vmul.f32 0.03125, %v858_v9 }
 0x68b   :  { %2781 = vrsqrt.f32 %v873_v12  ;;  %v872_v14 = vadd.f32 1e-05, %v868_v13 }
 0x68d   :  { %2783 = vrsqrt.f32 %v872_v14 }
 0x690   :  { %v864_v6 = vpop.xlane.xlu0 %863 }
 0x691   :  { %v870_v16 = vmul.f32 0.03125, %v864_v6 }
 0x693   :  { %v874_v20 = vadd.f32 1e-05, %v870_v16 }
 0x694   :  { %v867_v21 = vpop.xlane.xlu1 %866 }
 0x695   :  { %2785 = vrsqrt.f32 %v874_v20  ;;  %v871_v22 = vmul.f32 0.03125, %v867_v21 }
 0x697   :  { %v875_v23 = vadd.f32 1e-05, %v871_v22 }
 0x698   :  { %v2782_v24 = vpop.eup %2781 }
 0x699   :  { %v881_v25 = vmul.f32 %v2782_v24, %v849_v47  ;;  %2787 = vrsqrt.f32 %v875_v23  ;;  %v1055_v47 = vld [vmem:[%s3560_s1 + $0x98] sm:$0xff] }
 0x69a   :  { %v2784_v27 = vpop.eup %2783  ;;  %2578 = vmatprep.subr.mxu0 %v1055_v47 }
 0x69b   :  { %v880_v29 = vmul.f32 %v2784_v27, %v848_v52  ;;  %v889_v30 = vmul.f32 %v2306_v26, %v881_v25  ;;  %2579 = vmatpush3.msra.mxu0 %v1055_v47  ;;  %v1053_v52 = vld [vmem:[%s3560_s1 + $0x88] sm:$0xff] }
 0x69c   :  { %2580 = vmatprep.subr.mxu0 %v1054_v57 }
 0x69d   :  { %v888_v34 = vmul.f32 %v2306_v26, %v880_v29  ;;  %v897_v36 = vadd.f32 %v2307_v33, %v889_v30  ;;  %2581 = vmatpush3.msra.mxu0 %v1054_v57 }
 0x69e   :  { %2582 = vmatprep.subr.mxu0 %v1053_v52 }
 0x69f   :  { %v896_v35 = vadd.f32 %v2307_v33, %v888_v34  ;;  %2583 = vmatpush3.msra.mxu0 %v1053_v52 }
 0x6a0   :  { %2584 = vmatprep.subr.mxu0 %v1052_v48 }
 0x6a1   :  { %2568 = vmatprep.mubr.msk.f32.mxu1 %vm113_vm4, %v896_v35  ;;  %2585 = vmatpush3.msra.mxu0 %v1052_v48 }
 0x6a2   :  { %v2786_v37 = vpop.eup %2785  ;;  %2569 = vmatmul.mubr.msk.f32.vlgmr.msra.gmra.mxu1 %vm113_vm4, %v897_v36  ;;  %2586 = vmatprep.subr.mxu0 %v1051_v49 }
 0x6a3   :  { %v882_v53 = vmul.f32 %v2786_v37, %v850_v58  ;;  %2587 = vmatpush3.msra.mxu0 %v1051_v49  ;;  %v1046_v58 = vld [vmem:[%s3560_s1 + $0x50] sm:$0xff] }
 0x6a4   :  { %2588 = vmatprep.subr.mxu0 %v1050_v50 }
 0x6a5   :  { %v890_v38 = vmul.f32 %v2306_v26, %v882_v53  ;;  %2589 = vmatpush3.msra.mxu0 %v1050_v50 }
 0x6a6   :  { %v2788_v39 = vpop.eup %2787  ;;  %2590 = vmatprep.subr.mxu0 %v1049_v54 }
 0x6a7   :  { %v898_v51 = vadd.f32 %v2307_v33, %v890_v38  ;;  %v883_v42 = vmul.f32 %v2788_v39, %v851_v0  ;;  %2591 = vmatpush3.msra.mxu0 %v1049_v54  ;;  %v1042_v0 = vld [vmem:[%s3560_s1 + $0x30] sm:$0xff]  ;;  %v2313_v54 = vld [vmem:[%s3560_s1 + $0x28] ss:$0 sm:$0xff] }
 0x6a8   :  { %2592 = vmatprep.subr.mxu0 %v1048_v55 }
 0x6a9   :  { %2571 = vmatprep.mubr.msk.f32.mxu1 %vm113_vm4, %v898_v51  ;;  %v891_v43 = vmul.f32 %v2306_v26, %v883_v42  ;;  %2593 = vmatpush3.msra.mxu0 %v1048_v55 }
 0x6aa   :  { %2594 = vmatprep.subr.mxu0 %v1047_v56 }
 0x6ab   :  { %v899_v44 = vadd.f32 %v2307_v33, %v891_v43  ;;  %2595 = vmatpush3.msra.mxu0 %v1047_v56 }
 0x6ac   :  { %2596 = vmatprep.subr.mxu0 %v1046_v58 }
 0x6ad   :  { %2572 = vmatmul.mubr.msk.f32.gmra.mxu1 %vm113_vm4, %v899_v44  ;;  %2597 = vmatpush3.msra.mxu0 %v1046_v58 }
 0x6ae   :  { %2598 = vmatprep.subr.mxu0 %v1045_v59 }
 0x6af   :  { %2599 = vmatpush3.msra.mxu0 %v1045_v59 }
 0x6b0   :  { %2600 = vmatprep.subr.mxu0 %v1044_v60 }
 0x6b1   :  { %2601 = vmatpush3.msra.mxu0 %v1044_v60 }
 0x6b2   :  { %2602 = vmatprep.subr.mxu0 %v1043_v61 }
 0x6b3   :  { %2603 = vmatpush3.msra.mxu0 %v1043_v61 }
 0x6b4   :  { %2604 = vmatprep.subr.mxu0 %v1042_v0 }
 0x6b5   :  { %2605 = vmatpush3.msra.mxu0 %v1042_v0 }
 0x762   :  { %v2570_v63 = vpop.f32.mrf.mxu1 }
 0x763   :  { %v993_v1 = vadd.f32 %v2570_v63, %v2308_v62 }
 0x764   :  { %v987_v4 = vpop.f32.mrf.mxu1 }
 0x765   :  { %v1007_v2 = vmul.f32 %v993_v1, %v993_v1  ;;  %v988_v7 = vadd.f32 %v2308_v62, %v987_v4 }
 0x767   :  { %v1011_v10 = vmul.f32 %v1007_v2, %v993_v1  ;;  %v1006_v11 = vmul.f32 %v988_v7, %v988_v7 }
 0x769   :  { %v1015_v3 = vmul.f32 0.044715, %v1011_v10  ;;  %v1010_v9 = vmul.f32 %v1006_v11, %v988_v7 }
 0x76b   :  { %v1019_v12 = vadd.f32 %v1015_v3, %v993_v1  ;;  %v1014_v13 = vmul.f32 0.044715, %v1010_v9 }
 0x76d   :  { %v1023_v14 = vmul.f32 0.7978846, %v1019_v12  ;;  %v1018_v6 = vadd.f32 %v1014_v13, %v988_v7  ;;  %v2573_v16 = vpop.f32.mrf.mxu1 }
 0x76e   :  { %v1003_v20 = vadd.f32 %v2573_v16, %v2308_v62 }
 0x76f   :  { %2789 = vtanh.f32 %v1023_v14  ;;  %v1022_v21 = vmul.f32 0.7978846, %v1018_v6  ;;  %v997_v22 = vpop.f32.mrf.mxu1 }
 0x770   :  { %v1009_v23 = vmul.f32 %v1003_v20, %v1003_v20  ;;  %v998_v24 = vadd.f32 %v2308_v62, %v997_v22  ;;  %v1152_v62 = vld [vmem:[%s3560_s1 + $0xb0] sm:$0x7] }
 0x771   :  { %2791 = vtanh.f32 %v1022_v21  ;;  %v1180_v4 = vrot.slane %v1152_v62, %v77_v15  ;;  %v1200_v13 = vrot.slane %v1152_v62, %v97_v19 }
 0x772   :  { %v1013_v25 = vmul.f32 %v1009_v23, %v1003_v20  ;;  %v1008_v26 = vmul.f32 %v998_v24, %v998_v24 }
 0x774   :  { %v1017_v27 = vmul.f32 0.044715, %v1013_v25  ;;  %v1012_v29 = vmul.f32 %v1008_v26, %v998_v24 }
 0x776   :  { %v1021_v30 = vadd.f32 %v1017_v27, %v1003_v20  ;;  %v1016_v33 = vmul.f32 0.044715, %v1012_v29 }
 0x778   :  { %v1025_v34 = vmul.f32 0.7978846, %v1021_v30  ;;  %v1020_v35 = vadd.f32 %v1016_v33, %v998_v24 }
 0x77a   :  { %2793 = vtanh.f32 %v1025_v34  ;;  %v1024_v36 = vmul.f32 0.7978846, %v1020_v35 }
 0x77c   :  { %v2790_v37 = vpop.eup %2789  ;;  %2795 = vtanh.f32 %v1024_v36 }
 0x77d   :  { %v1031_v53 = vadd.f32 1.0, %v2790_v37 }
 0x77e   :  { %v2792_v38 = vpop.eup %2791 }
 0x77f   :  { %v1030_v39 = vadd.f32 1.0, %v2792_v38  ;;  %v1035_v51 = vmul.f32 0.5, %v1031_v53 }
 0x781   :  { %v1034_v42 = vmul.f32 0.5, %v1030_v39  ;;  %v1039_v44 = vmul.f32 %v1035_v51, %v993_v1 }
 0x783   :  { %v1038_v43 = vmul.f32 %v1034_v42, %v988_v7 }
 0x785   :  { %2606 = vmatprep.mubr.f32.mxu0 %v1038_v43 }
 0x786   :  { %2607 = vmatmul.mubr.f32.vlgmr.msra.gmra.mxu0 %v1039_v44 }
 0x787   :  { %v2794_v45 = vpop.eup %2793 }
 0x788   :  { %v1033_v46 = vadd.f32 1.0, %v2794_v45 }
 0x789   :  { %v2796_v47 = vpop.eup %2795 }
 0x78a   :  { %v1032_v57 = vadd.f32 1.0, %v2796_v47  ;;  %v1037_v52 = vmul.f32 0.5, %v1033_v46 }
 0x78c   :  { %v1036_v48 = vmul.f32 0.5, %v1032_v57  ;;  %v1041_v50 = vmul.f32 %v1037_v52, %v1003_v20 }
 0x78e   :  { %v1040_v49 = vmul.f32 %v1036_v48, %v998_v24 }
 0x790   :  { %2609 = vmatprep.mubr.f32.mxu0 %v1040_v49 }
 0x791   :  { %2610 = vmatmul.mubr.f32.gmra.mxu0 %v1041_v50 }
 0x846   :  { %v2608_v55 = vpop.f32.mrf.mxu0 }
 0x847   :  { %v1135_v56 = vadd.f32 %v2608_v55, %v2313_v54 }
 0x848   :  { %v1129_v58 = vpop.f32.mrf.mxu0 }
 0x849   :  { %v1130_v59 = vadd.f32 %v2313_v54, %v1129_v58  ;;  %v1149_v61 = vadd.f32 %v1135_v56, %v3140_v28 }
 0x84b   :  { %v1148_v60 = vadd.f32 %v1130_v59, %v3143_v32  ;;  %v1154_v63 = vrot.slane %v1149_v61, 7  ;;  %v1188_v32 = vrot.slane %v1152_v62, %v85_v18  ;;  %v1166_v28 = vrot.slane %v1149_v61, 1 }
 0x84d   :  { %v1153_v0 = vrot.slane %v1148_v60, 7  ;;  %v1165_v2 = vrot.slane %v1148_v60, 1  ;;  %v1190_v20 = vmul.f32 %v1188_v32, %v1149_v61  ;;  %v1189_v21 = vmul.f32 %v1188_v32, %v1148_v60 }
 0x84f   :  { %v1159_v10 = vsel %vm53_vm1, %v1153_v0, %v1154_v63  ;;  %v1171_v16 = vsel %vm66_vm2, %v1165_v2, %v1166_v28 }
 0x850   :  { %v1182_v12 = vmul.f32 %v1180_v4, %v1159_v10  ;;  %v1201_v25 = vmul.f32 %v1200_v13, %v1171_v16 }
 0x851   :  { %v2611_v1 = vpop.f32.mrf.mxu0 }
 0x852   :  { %v1145_v7 = vadd.f32 %v2611_v1, %v2313_v54 }
 0x853   :  { %v1139_v11 = vpop.f32.mrf.mxu0 }
 0x854   :  { %v1151_v3 = vadd.f32 %v1145_v7, %v3153_v41  ;;  %v1140_v9 = vadd.f32 %v2313_v54, %v1139_v11  ;;  %v1194_v41 = vadd.f32 %v1190_v20, %v1182_v12 }
 0x856   :  { %v1156_v14 = vrot.slane %v1151_v3, 7  ;;  %v1168_v6 = vrot.slane %v1151_v3, 1  ;;  %v1150_v15 = vadd.f32 %v1140_v9, %v3151_v40  ;;  %v1192_v30 = vmul.f32 %v1188_v32, %v1151_v3 }
 0x858   :  { %v1155_v22 = vrot.slane %v1150_v15, 7  ;;  %v1167_v18 = vrot.slane %v1150_v15, 1  ;;  %v1160_v23 = vsel %vm53_vm1, %v1156_v14, %v1153_v0  ;;  %v1172_v19 = vsel %vm66_vm2, %v1168_v6, %v1165_v2 }
 0x859   :  { %v1161_v24 = vsel %vm28_vm0, 0.0, %v1160_v23  ;;  %v1176_v29 = vsel %vm35_vm3, 0.0, %v1172_v19  ;;  %v1191_v36 = vmul.f32 %v1188_v32, %v1150_v15 }
 0x85a   :  { %v1170_v40 = vsel %vm66_vm2, %v1166_v28, %v1167_v18  ;;  %v1181_v26 = vmul.f32 %v1180_v4, %v1161_v24  ;;  %v1157_v27 = vsel %vm53_vm1, %v1155_v22, %v1156_v14  ;;  %v1158_v35 = vsel %vm53_vm1, %v1154_v63, %v1155_v22  ;;  %v1285_v14 = vld [vmem:[%s3561_s2 + $0x58] sm:$0xff] }
 0x85b   :  { %v1202_v33 = vmul.f32 %v1200_v13, %v1170_v40  ;;  %v1184_v34 = vmul.f32 %v1180_v4, %v1157_v27  ;;  %v1169_v53 = vsel %vm66_vm2, %v1167_v18, %v1168_v6  ;;  %v1183_v38 = vmul.f32 %v1180_v4, %v1158_v35  ;;  %v1284_v6 = vld [vmem:[%s3561_s2 + $0x50] sm:$0xff] }
 0x85c   :  { %v1193_v37 = vadd.f32 %v1189_v21, %v1181_v26  ;;  %v1204_v42 = vmul.f32 %v1200_v13, %v1176_v29  ;;  %v1203_v45 = vmul.f32 %v1200_v13, %v1169_v53  ;;  %v1286_v13 = vld [vmem:[%s3561_s2 + $0x60] sm:$0xff]  ;;  %v2314_v29 = vld [vmem:[%s3560_s1 + $0xb3] ss:$0 sm:$0xff]  ;;  %v2315_v35 = vld [vmem:[%s3560_s1 + $0xb4] ss:$0 sm:$0xff] }
 0x85d   :  { %v1206_v39 = vadd.f32 %v1202_v33, %v1194_v41  ;;  %v1196_v51 = vadd.f32 %v1192_v30, %v1184_v34  ;;  %v1195_v44 = vadd.f32 %v1191_v36, %v1183_v38  ;;  %2612 = vmatprep.subr.mxu1 %v1286_v13 }
 0x85e   :  { %v1205_v43 = vadd.f32 %v1201_v25, %v1193_v37  ;;  %2613 = vmatpush3.msra.mxu1 %v1286_v13 }
 0x85f   :  { %v3276_v31 = vadd.f32 %v1206_v39, %v1149_v61  ;;  %v1208_v46 = vadd.f32 %v1204_v42, %v1196_v51  ;;  %v1207_v57 = vadd.f32 %v1203_v45, %v1195_v44  ;;  %2614 = vmatprep.subr.mxu1 %v1285_v14 }
 0x860   :  { %v3278_v47 = vadd.f32 %v1205_v43, %v1148_v60  ;;  %2615 = vmatpush3.msra.mxu1 %v1285_v14  ;;  %v2853_v14 = vld [vmem:[%s3560_s1 + $0x8] sm:$0xff] }
 0x861   :  { %v1218_v52 = vsel %vm113_vm4, %v3276_v31, 0.0  ;;  %v3282_v48 = vadd.f32 %v1208_v46, %v1151_v3  ;;  %v3286_v49 = vadd.f32 %v1207_v57, %v1150_v15  ;;  %v1283_v15 = vld [vmem:[%s3561_s2 + $0x48] sm:$0xff]  ;;  %2616 = vmatprep.subr.mxu1 %v1284_v6 }
 0x862   :  { %1219 = vadd.xlane.f32.xlu1 %v1218_v52  ;;  %v1215_v8 = vsel %vm113_vm4, %v3278_v47, 0.0  ;;  %2617 = vmatpush3.msra.mxu1 %v1284_v6 }
 0x863   :  { %1216 = vadd.xlane.f32.xlu0 %v1215_v8  ;;  %v1224_v50 = vsel %vm113_vm4, %v3282_v48, 0.0  ;;  %v1221_v54 = vsel %vm113_vm4, %v3286_v49, 0.0  ;;  %2618 = vmatprep.subr.mxu1 %v1283_v15  ;;  %v2316_v8 = vld [vmem:[%s3561_s2 + $0x88] ss:$0 sm:$0xff] }
 0x864   :  { %2619 = vmatpush3.msra.mxu1 %v1283_v15 }
 0x866   :  { %1225 = vadd.xlane.f32.xlu1 %v1224_v50 }
 0x867   :  { %1222 = vadd.xlane.f32.xlu0 %v1221_v54 }
 0x8eb   :  { %v1220_v55 = vpop.xlane.xlu1 %1219 }
 0x8ec   :  { %v1228_v56 = vmul.f32 0.03125, %v1220_v55  ;;  %v1217_v58 = vpop.xlane.xlu0 %1216 }
 0x8ed   :  { %v1227_v59 = vmul.f32 0.03125, %v1217_v58 }
 0x8ee   :  { %v1232_v60 = vsub.f32 %v3276_v31, %v1228_v56 }
 0x8ef   :  { %v1231_v61 = vsub.f32 %v3278_v47, %v1227_v59  ;;  %v1226_v0 = vpop.xlane.xlu1 %1225 }
 0x8f0   :  { %v1230_v62 = vmul.f32 0.03125, %v1226_v0  ;;  %v1223_v63 = vpop.xlane.xlu0 %1222  ;;  %v1236_v1 = vmul.f32 %v1232_v60, %v1232_v60 }
 0x8f1   :  { %v1229_v4 = vmul.f32 0.03125, %v1223_v63  ;;  %v1235_v2 = vmul.f32 %v1231_v61, %v1231_v61 }
 0x8f2   :  { %v1234_v7 = vsub.f32 %v3282_v48, %v1230_v62  ;;  %v1242_v10 = vsel %vm113_vm4, %v1236_v1, 0.0 }
 0x8f3   :  { %v1233_v32 = vsub.f32 %v3286_v49, %v1229_v4  ;;  %1243 = vadd.xlane.f32.xlu1 %v1242_v10  ;;  %v1239_v11 = vsel %vm113_vm4, %v1235_v2, 0.0 }
 0x8f4   :  { %1240 = vadd.xlane.f32.xlu0 %v1239_v11  ;;  %v1238_v28 = vmul.f32 %v1234_v7, %v1234_v7 }
 0x8f5   :  { %v1237_v3 = vmul.f32 %v1233_v32, %v1233_v32 }
 0x8f6   :  { %v1248_v9 = vsel %vm113_vm4, %v1238_v28, 0.0 }
 0x8f7   :  { %1249 = vadd.xlane.f32.xlu1 %v1248_v9  ;;  %v1245_v12 = vsel %vm113_vm4, %v1237_v3, 0.0 }
 0x8f8   :  { %1246 = vadd.xlane.f32.xlu0 %v1245_v12 }
 0x97c   :  { %v1244_v16 = vpop.xlane.xlu1 %1243 }
 0x97d   :  { %v1252_v20 = vmul.f32 0.03125, %v1244_v16  ;;  %v1241_v21 = vpop.xlane.xlu0 %1240 }
 0x97e   :  { %v1251_v22 = vmul.f32 0.03125, %v1241_v21 }
 0x97f   :  { %v1256_v18 = vadd.f32 1e-05, %v1252_v20  ;;  %v2854_v20 = vld [vmem:[%s3560_s1] sm:$0xff] }
 0x980   :  { %v1255_v23 = vadd.f32 1e-05, %v1251_v22  ;;  %v1250_v41 = vpop.xlane.xlu1 %1249 }
 0x981   :  { %2797 = vrsqrt.f32 %v1256_v18  ;;  %v1254_v24 = vmul.f32 0.03125, %v1250_v41  ;;  %v1247_v25 = vpop.xlane.xlu0 %1246  ;;  %v2855_v18 = vld [vmem:[%s3560_s1 + $0x18] sm:$0xff] }
 0x982   :  { %2799 = vrsqrt.f32 %v1255_v23  ;;  %v1253_v19 = vmul.f32 0.03125, %v1247_v25 }
 0x983   :  { %v1258_v40 = vadd.f32 1e-05, %v1254_v24 }
 0x984   :  { %v1257_v26 = vadd.f32 1e-05, %v1253_v19 }
 0x985   :  { %2801 = vrsqrt.f32 %v1258_v40  ;;  %v2856_v40 = vld [vmem:[%s3560_s1 + $0x10] sm:$0xff] }
 0x986   :  { %2803 = vrsqrt.f32 %v1257_v26 }
 0x98e   :  { %v2798_v27 = vpop.eup %2797 }
 0x98f   :  { %v2800_v30 = vpop.eup %2799  ;;  %v1264_v33 = vmul.f32 %v2798_v27, %v1232_v60 }
 0x990   :  { %v1263_v34 = vmul.f32 %v2800_v30, %v1231_v61 }
 0x991   :  { %v1272_v36 = vmul.f32 %v2314_v29, %v1264_v33 }
 0x992   :  { %v2802_v37 = vpop.eup %2801  ;;  %v1271_v53 = vmul.f32 %v2314_v29, %v1263_v34 }
 0x993   :  { %v2804_v38 = vpop.eup %2803  ;;  %v1266_v39 = vmul.f32 %v2802_v37, %v1234_v7  ;;  %v1280_v43 = vadd.f32 %v2315_v35, %v1272_v36 }
 0x994   :  { %v1279_v51 = vadd.f32 %v2315_v35, %v1271_v53  ;;  %v1265_v42 = vmul.f32 %v2804_v38, %v1233_v32 }
 0x995   :  { %v1274_v44 = vmul.f32 %v2314_v29, %v1266_v39 }
 0x996   :  { %2620 = vmatprep.mubr.msk.f32.mxu1 %vm113_vm4, %v1279_v51  ;;  %v1273_v45 = vmul.f32 %v2314_v29, %v1265_v42 }
 0x997   :  { %2621 = vmatmul.mubr.msk.f32.vlgmr.msra.gmra.mxu1 %vm113_vm4, %v1280_v43  ;;  %v1282_v57 = vadd.f32 %v2315_v35, %v1274_v44 }
 0x998   :  { %v1281_v46 = vadd.f32 %v2315_v35, %v1273_v45 }
 0x99a   :  { %2623 = vmatprep.mubr.msk.f32.mxu1 %vm113_vm4, %v1281_v46 }
 0x99b   :  { %2624 = vmatmul.mubr.msk.f32.gmra.mxu1 %vm113_vm4, %v1282_v57 }
 0xa57   :  { %v2622_v52 = vpop.f32.mrf.mxu1 }
 0xa58   :  { %v3338_v61 = vadd.f32 %v2622_v52, %v2316_v8 }
 0xa59   :  { %v1370_v50 = vpop.f32.mrf.mxu1 }
 0xa5a   :  { %v3325_v54 = vadd.f32 %v2316_v8, %v1370_v50  ;;  %v1390_v4 = vmul.f32 %v3018_v5, %v3338_v61 }
 0xa5b   :  { %v2625_v55 = vpop.f32.mrf.mxu1 }
 0xa5c   :  { %v3327_v56 = vadd.f32 %v2625_v55, %v2316_v8  ;;  %v1389_v58 = vmul.f32 %v3018_v5, %v3325_v54  ;;  %v1554_v10 = vmul.f32 %v3053_v17, %v3325_v54 }
 0xa5d   :  { %v1380_v59 = vpop.f32.mrf.mxu1 }
 0xa5e   :  { %v3331_v60 = vadd.f32 %v2316_v8, %v1380_v59  ;;  %2634 = vmatprep.mubr.msk.f32.mxu1 %vm113_vm4, %v1389_v58  ;;  %1403 = vrot.lane.b32.xlu0 %v3327_v56, %s2880_s8  ;;  %v1392_v7 = vmul.f32 %v3018_v5, %v3327_v56  ;;  %v1557_v11 = vmul.f32 %v3053_v17, %v3327_v56 }
 0xa60   :  { %1401 = vrot.lane.b32.xlu1 %v3331_v60, %s2880_s8  ;;  %v1391_v2 = vmul.f32 %v3018_v5, %v3331_v60  ;;  %v1555_v5 = vmul.f32 %v3053_v17, %v3338_v61  ;;  %v1556_v32 = vmul.f32 %v3053_v17, %v3331_v60 }
 0xa64   :  { %1399 = vrot.lane.b32.xlu1 %v3338_v61, %s2880_s8 }
 0xa68   :  { %1397 = vrot.lane.b32.xlu1 %v3325_v54, %s2880_s8 }
 0xad0   :  { %v1404_v0 = vpop.permute.xlu0 %1403 }
 0xad1   :  { %2626 = vmatprep.subr.msk.mxu1 %vm113_vm4, %v1404_v0 }
 0xad2   :  { %2627 = vmatpush3.xpose.msk.msra.mxu1 %vm113_vm4, %v1404_v0  ;;  %v1402_v62 = vpop.permute.xlu1 %1401 }
 0xad3   :  { %2628 = vmatprep.subr.msk.mxu1 %vm113_vm4, %v1402_v62 }
 0xad6   :  { %2629 = vmatpush3.xpose.msk.msra.mxu1 %vm113_vm4, %v1402_v62  ;;  %v1400_v63 = vpop.permute.xlu1 %1399 }
 0xad7   :  { %2630 = vmatprep.subr.msk.mxu1 %vm113_vm4, %v1400_v63 }
 0xada   :  { %2631 = vmatpush3.xpose.msk.msra.mxu1 %vm113_vm4, %v1400_v63  ;;  %v1398_v1 = vpop.permute.xlu1 %1397 }
 0xadb   :  { %2632 = vmatprep.subr.msk.mxu1 %vm113_vm4, %v1398_v1 }
 0xade   :  { %2633 = vmatpush3.xpose.msk.msra.mxu1 %vm113_vm4, %v1398_v1 }
 0xadf   :  { %2640 = vmatprep.subr.msk.mxu1 %vm113_vm4, %v1404_v0 }
 0xae1   :  { %2635 = vmatmul.mubr.msk.f32.vlgmr.msra.gmra.mxu1 %vm113_vm4, %v1390_v4 }
 0xae2   :  { %2637 = vmatprep.mubr.msk.f32.mxu1 %vm113_vm4, %v1391_v2  ;;  %2641 = vmatpush3.xpose.msk.msra.mxu1 %vm113_vm4, %v1404_v0 }
 0xae3   :  { %2642 = vmatprep.subr.msk.mxu1 %vm113_vm4, %v1402_v62 }
 0xae5   :  { %2638 = vmatmul.mubr.msk.f32.gmra.mxu1 %vm113_vm4, %v1392_v7 }
 0xae6   :  { %2643 = vmatpush3.xpose.msk.msra.mxu1 %vm113_vm4, %v1402_v62  ;;  %2648 = vmatprep.mubr.msk.f32.mxu1 %vm113_vm4, %v1554_v10 }
 0xae7   :  { %2644 = vmatprep.subr.msk.mxu1 %vm113_vm4, %v1400_v63 }
 0xaea   :  { %2645 = vmatpush3.xpose.msk.msra.mxu1 %vm113_vm4, %v1400_v63 }
 0xaeb   :  { %2646 = vmatprep.subr.msk.mxu1 %vm113_vm4, %v1398_v1 }
 0xaee   :  { %2647 = vmatpush3.xpose.msk.msra.mxu1 %vm113_vm4, %v1398_v1 }
 0xaf1   :  { %2649 = vmatmul.mubr.msk.f32.vlgmr.msra.gmra.mxu1 %vm113_vm4, %v1555_v5 }
 0xaf2   :  { %2651 = vmatprep.mubr.msk.f32.mxu1 %vm113_vm4, %v1556_v32 }
 0xaf5   :  { %2652 = vmatmul.mubr.msk.f32.gmra.mxu1 %vm113_vm4, %v1557_v11 }
 0xba1   :  { %v2636_v28 = vpop.f32.mrf.mxu1 }
 0xba2   :  { %v1497_v16 = vadd.f32 %v2853_v14, %v2636_v28 }
 0xba3   :  { %v1491_v3 = vpop.f32.mrf.mxu1 }
 0xba4   :  { %v1513_v19 = vsel %vm113_vm4, %v1497_v16, -inf  ;;  %v1492_v30 = vadd.f32 %v2854_v20, %v1491_v3 }
 0xba5   :  { %v2639_v9 = vpop.f32.mrf.mxu1 }
 0xba6   :  { %v1507_v25 = vadd.f32 %v2855_v18, %v2639_v9  ;;  %v1510_v35 = vsel %vm113_vm4, %v1492_v30, -inf }
 0xba7   :  { %v1501_v12 = vpop.f32.mrf.mxu1 }
 0xba8   :  { %v1519_v29 = vsel %vm113_vm4, %v1507_v25, -inf  ;;  %v1502_v34 = vadd.f32 %v2856_v40, %v1501_v12 }
 0xbaa   :  { %v1516_v36 = vsel %vm113_vm4, %v1502_v34, -inf }
 0xbb1   :  { %v2650_v13 = vpop.f32.mrf.mxu1 }
 0xbb2   :  { %v1642_v6 = vadd.f32 %v2853_v14, %v2650_v13 }
 0xbb3   :  { %v1636_v15 = vpop.f32.mrf.mxu1 }
 0xbb4   :  { %v1637_v21 = vadd.f32 %v2854_v20, %v1636_v15  ;;  %v1658_v17 = vsel %vm113_vm4, %v1642_v6, -inf }
 0xbb5   :  { %1659 = vmax.xlane.f32.xlu1 %v1658_v17  ;;  %v2653_v22 = vpop.f32.mrf.mxu1 }
 0xbb6   :  { %v1652_v23 = vadd.f32 %v2855_v18, %v2653_v22  ;;  %v1655_v41 = vsel %vm113_vm4, %v1637_v21, -inf }
 0xbb7   :  { %v1646_v24 = vpop.f32.mrf.mxu1  ;;  %1656 = vmax.xlane.f32.xlu0 %v1655_v41 }
 0xbb8   :  { %v1647_v26 = vadd.f32 %v2856_v40, %v1646_v24  ;;  %v1664_v27 = vsel %vm113_vm4, %v1652_v23, -inf }
 0xbb9   :  { %1514 = vmax.xlane.f32.xlu1 %v1513_v19 }
 0xbba   :  { %v1661_v33 = vsel %vm113_vm4, %v1647_v26, -inf }
 0xbbb   :  { %1665 = vmax.xlane.f32.xlu0 %v1664_v27 }
 0xbbd   :  { %1520 = vmax.xlane.f32.xlu1 %v1519_v29 }
 0xbbf   :  { %1662 = vmax.xlane.f32.xlu0 %v1661_v33 }
 0xbc3   :  { %1511 = vmax.xlane.f32.xlu0 %v1510_v35 }
 0xbc7   :  { %1517 = vmax.xlane.f32.xlu0 %v1516_v36 }
 0xbce   :  { %1703 = vrot.lane.b32.xlu1 %v3331_v60, %s2881_s17 }
 0xbd2   :  { %1701 = vrot.lane.b32.xlu1 %v3338_v61, %s2881_s17 }
 0xbd6   :  { %1699 = vrot.lane.b32.xlu1 %v3325_v54, %s2881_s17 }
 0xbda   :  { %1812 = vrot.lane.b32.xlu1 %v3331_v60, %s2882_s18 }
 0xbdd   :  { %1705 = vrot.lane.b32.xlu0 %v3327_v56, %s2881_s17 }
 0xbe1   :  { %1814 = vrot.lane.b32.xlu0 %v3327_v56, %s2882_s18 }
 0xc3e   :  { %v1660_v37 = vpop.xlane.xlu1 %1659 }
 0xc3f   :  { %v1668_v42 = vsub.f32 %v1642_v6, %v1660_v37 }
 0xc40   :  { %v1657_v53 = vpop.xlane.xlu0 %1656 }
 0xc41   :  { %v1673_v52 = vmul.f32 1.442695, %v1668_v42  ;;  %v1667_v59 = vsub.f32 %v1637_v21, %v1657_v53 }
 0xc42   :  { %v1515_v38 = vpop.xlane.xlu1 %1514 }
 0xc43   :  { %v1523_v39 = vsub.f32 %v1497_v16, %v1515_v38  ;;  %v1671_v63 = vmul.f32 1.442695, %v1667_v59 }
 0xc44   :  { %v1666_v51 = vpop.xlane.xlu0 %1665 }
 0xc45   :  { %v1528_v43 = vmul.f32 1.442695, %v1523_v39  ;;  %v1670_v46 = vsub.f32 %v1652_v23, %v1666_v51 }
 0xc46   :  { %v1521_v44 = vpop.xlane.xlu1 %1520 }
 0xc47   :  { %2805 = vpow2.f32 %v1528_v43  ;;  %v1525_v45 = vsub.f32 %v1507_v25, %v1521_v44  ;;  %v1677_v50 = vmul.f32 1.442695, %v1670_v46 }
 0xc48   :  { %v1663_v57 = vpop.xlane.xlu0 %1662 }
 0xc49   :  { %v1532_v8 = vmul.f32 1.442695, %v1525_v45  ;;  %v1669_v1 = vsub.f32 %v1647_v26, %v1663_v57 }
 0xc4a   :  { %v1704_v56 = vpop.permute.xlu1 %1703 }
 0xc4b   :  { %2807 = vpow2.f32 %v1532_v8  ;;  %v1675_v32 = vmul.f32 1.442695, %v1669_v1 }
 0xc4c   :  { %v1512_v55 = vpop.xlane.xlu0 %1511  ;;  %2809 = vpow2.f32 %v1673_v52 }
 0xc4d   :  { %v1522_v58 = vsub.f32 %v1492_v30, %v1512_v55  ;;  %2811 = vpow2.f32 %v1677_v50 }
 0xc4e   :  { %v1702_v7 = vpop.permute.xlu1 %1701 }
 0xc4f   :  { %v1526_v60 = vmul.f32 1.442695, %v1522_v58 }
 0xc50   :  { %v1518_v0 = vpop.xlane.xlu0 %1517 }
 0xc51   :  { %2813 = vpow2.f32 %v1526_v60  ;;  %v1524_v62 = vsub.f32 %v1502_v34, %v1518_v0  ;;  %v2345_v60 = vld [vmem:[%s3560_s1 + $0xb5] ss:$0 sm:$0xff] }
 0xc52   :  { %v1700_v9 = vpop.permute.xlu1 %1699 }
 0xc53   :  { %v1530_v4 = vmul.f32 1.442695, %v1524_v62 }
 0xc54   :  { %v3413_v2 = vpop.eup %2805  ;;  %v1706_v10 = vpop.permute.xlu0 %1705 }
 0xc55   :  { %2815 = vpow2.f32 %v1530_v4  ;;  %2654 = vmatprep.subr.mxu0 %v1706_v10  ;;  %v1537_v5 = vsel %vm113_vm4, %v3413_v2, 0.0 }
 0xc56   :  { %1538 = vadd.xlane.f32.xlu1 %v1537_v5  ;;  %2655 = vmatpush3.msra.mxu0 %v1706_v10  ;;  %2817 = vpow2.f32 %v1671_v63  ;;  %v1813_v41 = vpop.permute.xlu1 %1812 }
 0xc57   :  { %2656 = vmatprep.subr.mxu0 %v1704_v56  ;;  %2819 = vpow2.f32 %v1675_v32 }
 0xc58   :  { %v3417_v11 = vpop.eup %2807  ;;  %2657 = vmatpush3.msra.mxu0 %v1704_v56  ;;  %v1815_v12 = vpop.permute.xlu0 %1814 }
 0xc59   :  { %2658 = vmatprep.subr.mxu0 %v1702_v7  ;;  %v1543_v28 = vsel %vm113_vm4, %v3417_v11, 0.0  ;;  %v2810_v3 = vpop.eup %2809 }
 0xc5a   :  { %1544 = vadd.xlane.f32.xlu1 %v1543_v28  ;;  %2659 = vmatpush3.msra.mxu0 %v1702_v7  ;;  %v2812_v13 = vpop.eup %2811  ;;  %v1682_v14 = vsel %vm113_vm4, %v2810_v3, 0.0 }
 0xc5b   :  { %2660 = vmatprep.subr.mxu0 %v1700_v9  ;;  %v1688_v16 = vsel %vm113_vm4, %v2812_v13, 0.0 }
 0xc5c   :  { %2661 = vmatpush3.msra.mxu0 %v1700_v9 }
 0xc5d   :  { %2668 = vmatprep.subr.mxu0 %v1815_v12 }
 0xc5e   :  { %v2814_v6 = vpop.eup %2813  ;;  %1683 = vadd.xlane.f32.xlu1 %v1682_v14 }
 0xc5f   :  { %v1534_v15 = vsel %vm113_vm4, %v2814_v6, 0.0 }
 0xc60   :  { %1535 = vadd.xlane.f32.xlu0 %v1534_v15 }
 0xc62   :  { %v2816_v20 = vpop.eup %2815  ;;  %1689 = vadd.xlane.f32.xlu1 %v1688_v16 }
 0xc63   :  { %v1540_v21 = vsel %vm113_vm4, %v2816_v20, 0.0  ;;  %v2818_v17 = vpop.eup %2817 }
 0xc64   :  { %1541 = vadd.xlane.f32.xlu0 %v1540_v21  ;;  %v1679_v22 = vsel %vm113_vm4, %v2818_v17, 0.0  ;;  %v2820_v18 = vpop.eup %2819 }
 0xc65   :  { %v1685_v23 = vsel %vm113_vm4, %v2820_v18, 0.0 }
 0xc68   :  { %1680 = vadd.xlane.f32.xlu0 %v1679_v22 }
 0xc6c   :  { %1686 = vadd.xlane.f32.xlu0 %v1685_v23 }
 0xc73   :  { %1808 = vrot.lane.b32.xlu1 %v3325_v54, %s2882_s18 }
 0xc82   :  { %1810 = vrot.lane.b32.xlu0 %v3338_v61, %s2882_s18 }
 0xcdf   :  { %v1539_v24 = vpop.xlane.xlu1 %1538 }
 0xce3   :  { %v1545_v25 = vpop.xlane.xlu1 %1544 }
 0xce7   :  { %v1684_v40 = vpop.xlane.xlu1 %1683 }
 0xce8   :  { %2821 = vrcp.f32 %v1684_v40 }
 0xce9   :  { %v1536_v19 = vpop.xlane.xlu0 %1535 }
 0xceb   :  { %v1690_v29 = vpop.xlane.xlu1 %1689 }
 0xced   :  { %v1542_v26 = vpop.xlane.xlu0 %1541 }
 0xcef   :  { %v1809_v44 = vpop.permute.xlu1 %1808 }
 0xcf1   :  { %v1681_v27 = vpop.xlane.xlu0 %1680 }
 0xcf2   :  { %2823 = vrcp.f32 %v1681_v27 }
 0xcf3   :  { %2825 = vrcp.f32 %v1536_v19 }
 0xcf4   :  { %2827 = vrcp.f32 %v1690_v29 }
 0xcf5   :  { %v1687_v30 = vpop.xlane.xlu0 %1686  ;;  %v2822_v54 = vpop.eup %2821 }
 0xcf6   :  { %2829 = vrcp.f32 %v1687_v30  ;;  %v1696_v35 = vmul.f32 %v2822_v54, %v2810_v3  ;;  %v2003_v30 = vld [vmem:[%s3561_s2 + $0x80] sm:$0xff]  ;;  %v2002_v54 = vld [vmem:[%s3561_s2 + $0x78] sm:$0xff] }
 0xcf7   :  { %2831 = vrcp.f32 %v1539_v24  ;;  %2682 = vmatprep.subr.mxu1 %v2003_v30 }
 0xcf8   :  { %2833 = vrcp.f32 %v1542_v26  ;;  %2683 = vmatpush3.msra.mxu1 %v2003_v30 }
 0xcf9   :  { %2835 = vrcp.f32 %v1545_v25  ;;  %v1811_v51 = vpop.permute.xlu0 %1810  ;;  %2684 = vmatprep.subr.mxu1 %v2002_v54 }
 0xcfa   :  { %2685 = vmatpush3.msra.mxu1 %v2002_v54 }
 0xcff   :  { %v2824_v33 = vpop.eup %2823 }
 0xd00   :  { %v1695_v61 = vmul.f32 %v2824_v33, %v2818_v17  ;;  %v2826_v34 = vpop.eup %2825  ;;  %v2001_v33 = vld [vmem:[%s3561_s2 + $0x70] sm:$0xff] }
 0xd01   :  { %v2828_v36 = vpop.eup %2827  ;;  %v1550_v42 = vmul.f32 %v2826_v34, %v2814_v6  ;;  %2686 = vmatprep.subr.mxu1 %v2001_v33 }
 0xd02   :  { %2662 = vmatprep.mubr.msk.f32.mxu0 %vm113_vm4, %v1695_v61  ;;  %v1698_v38 = vmul.f32 %v2828_v36, %v2812_v13  ;;  %v2000_v61 = vld [vmem:[%s3561_s2 + $0x68] sm:$0xff]  ;;  %2687 = vmatpush3.msra.mxu1 %v2001_v33 }
 0xd03   :  { %v2830_v37 = vpop.eup %2829  ;;  %2663 = vmatmul.mubr.msk.f32.vlgmr.msra.gmra.mxu0 %vm113_vm4, %v1696_v35  ;;  %2688 = vmatprep.subr.mxu1 %v2000_v61 }
 0xd04   :  { %2669 = vmatpush3.msra.mxu0 %v1815_v12  ;;  %v1697_v53 = vmul.f32 %v2830_v37, %v2820_v18  ;;  %v2832_v39 = vpop.eup %2831  ;;  %2689 = vmatpush3.msra.mxu1 %v2000_v61 }
 0xd05   :  { %2670 = vmatprep.subr.mxu0 %v1813_v41  ;;  %v2834_v43 = vpop.eup %2833  ;;  %v1551_v45 = vmul.f32 %v2832_v39, %v3413_v2 }
 0xd06   :  { %2671 = vmatpush3.msra.mxu0 %v1813_v41  ;;  %2665 = vmatprep.mubr.msk.f32.mxu0 %vm113_vm4, %v1697_v53  ;;  %v2836_v46 = vpop.eup %2835  ;;  %v1552_v57 = vmul.f32 %v2834_v43, %v2816_v20 }
 0xd07   :  { %2672 = vmatprep.subr.mxu0 %v1811_v51  ;;  %2666 = vmatmul.mubr.msk.f32.gmra.mxu0 %vm113_vm4, %v1698_v38  ;;  %v1553_v52 = vmul.f32 %v2836_v46, %v3417_v11 }
 0xd08   :  { %2673 = vmatpush3.msra.mxu0 %v1811_v51  ;;  %2676 = vmatprep.mubr.msk.f32.mxu0 %vm113_vm4, %v1550_v42 }
 0xd09   :  { %2674 = vmatprep.subr.mxu0 %v1809_v44 }
 0xd0a   :  { %2675 = vmatpush3.msra.mxu0 %v1809_v44 }
 0xd0b   :  { %2677 = vmatmul.mubr.msk.f32.vlgmr.msra.gmra.mxu0 %vm113_vm4, %v1551_v45 }
 0xd0c   :  { %2679 = vmatprep.mubr.msk.f32.mxu0 %vm113_vm4, %v1552_v57 }
 0xd0f   :  { %2680 = vmatmul.mubr.msk.f32.gmra.mxu0 %vm113_vm4, %v1553_v52  ;;  %v2346_v52 = vld [vmem:[%s3560_s1 + $0xb6] ss:$0 sm:$0xff] }
 0xdc3   :  { %v2664_v8 = vpop.f32.mrf.mxu0 }
 0xdc5   :  { %v1789_v50 = vpop.f32.mrf.mxu0 }
 0xdc7   :  { %v2667_v55 = vpop.f32.mrf.mxu0 }
 0xdc9   :  { %v1799_v58 = vpop.f32.mrf.mxu0 }
 0xdcb   :  { %v2678_v56 = vpop.f32.mrf.mxu0 }
 0xdcc   :  { %v1904_v59 = vadd.f32 %v2678_v56, %v2664_v8 }
 0xdcd   :  { %v1898_v0 = vpop.f32.mrf.mxu0 }
 0xdce   :  { %v1918_v62 = vadd.f32 %v1904_v59, %v3276_v31  ;;  %v1899_v63 = vadd.f32 %v1898_v0, %v1789_v50 }
 0xdcf   :  { %v2681_v1 = vpop.f32.mrf.mxu0 }
 0xdd0   :  { %v3445_v4 = vadd.f32 %v2345_v60, %v1918_v62  ;;  %v1917_v2 = vadd.f32 %v1899_v63, %v3278_v47  ;;  %v1914_v7 = vadd.f32 %v2681_v1, %v2667_v55 }
 0xdd1   :  { %v1908_v10 = vpop.f32.mrf.mxu0 }
 0xdd2   :  { %v3448_v5 = vadd.f32 %v2345_v60, %v1917_v2  ;;  %v1909_v32 = vadd.f32 %v1908_v10, %v1799_v58  ;;  %v1935_v11 = vsel %vm113_vm4, %v3445_v4, 0.0  ;;  %v1920_v28 = vadd.f32 %v1914_v7, %v3282_v48  ;;  %v2347_v58 = vld [vmem:[%s3560_s1 + $0xb7] ss:$0 sm:$0xff] }
 0xdd3   :  { %1936 = vadd.xlane.f32.xlu1 %v1935_v11  ;;  %v2157_v11 = vld [vmem:[%s3560_s1 + $0x138] sm:$0xff] }
 0xdd4   :  { %v1919_v3 = vadd.f32 %v1909_v32, %v3286_v49  ;;  %v1932_v31 = vsel %vm113_vm4, %v3448_v5, 0.0  ;;  %v3458_v47 = vadd.f32 %v2345_v60, %v1920_v28  ;;  %2696 = vmatprep.subr.mxu0 %v2157_v11  ;;  %v2156_v28 = vld [vmem:[%s3560_s1 + $0x130] sm:$0xff] }
 0xdd5   :  { %1933 = vadd.xlane.f32.xlu0 %v1932_v31  ;;  %2697 = vmatpush3.msra.mxu0 %v2157_v11  ;;  %v2154_v31 = vld [vmem:[%s3560_s1 + $0x120] sm:$0xff] }
 0xdd6   :  { %v3456_v9 = vadd.f32 %v2345_v60, %v1919_v3  ;;  %v1941_v13 = vsel %vm113_vm4, %v3458_v47, 0.0  ;;  %2698 = vmatprep.subr.mxu0 %v2156_v28  ;;  %v2155_v3 = vld [vmem:[%s3560_s1 + $0x128] sm:$0xff] }
 0xdd7   :  { %2699 = vmatpush3.msra.mxu0 %v2156_v28  ;;  %v2353_v28 = vld [vmem:[%s3560_s1 + $0xb8] ss:$0 sm:$0xff] }
 0xdd8   :  { %v1938_v12 = vsel %vm113_vm4, %v3456_v9, 0.0  ;;  %2700 = vmatprep.subr.mxu0 %v2155_v3 }
 0xdd9   :  { %1939 = vadd.xlane.f32.xlu0 %v1938_v12  ;;  %2701 = vmatpush3.msra.mxu0 %v2155_v3  ;;  %v2153_v12 = vld [vmem:[%s3560_s1 + $0x118] sm:$0xff] }
 0xdda   :  { %2702 = vmatprep.subr.mxu0 %v2154_v31 }
 0xddb   :  { %2703 = vmatpush3.msra.mxu0 %v2154_v31 }
 0xddc   :  { %2704 = vmatprep.subr.mxu0 %v2153_v12 }
 0xddd   :  { %1942 = vadd.xlane.f32.xlu0 %v1941_v13  ;;  %2705 = vmatpush3.msra.mxu0 %v2153_v12  ;;  %v2152_v13 = vld [vmem:[%s3560_s1 + $0x110] sm:$0xff] }
 0xdde   :  { %2706 = vmatprep.subr.mxu0 %v2152_v13 }
 0xddf   :  { %2707 = vmatpush3.msra.mxu0 %v2152_v13 }
 0xe5c   :  { %v1937_v14 = vpop.xlane.xlu1 %1936 }
 0xe5d   :  { %v1945_v48 = vmul.f32 0.03125, %v1937_v14  ;;  %v2151_v14 = vld [vmem:[%s3560_s1 + $0x108] sm:$0xff] }
 0xe5e   :  { %v1934_v6 = vpop.xlane.xlu0 %1933  ;;  %2708 = vmatprep.subr.mxu0 %v2151_v14 }
 0xe5f   :  { %v1949_v49 = vsub.f32 %v3445_v4, %v1945_v48  ;;  %v1944_v15 = vmul.f32 0.03125, %v1934_v6  ;;  %2709 = vmatpush3.msra.mxu0 %v2151_v14  ;;  %v2150_v48 = vld [vmem:[%s3560_s1 + $0x100] sm:$0xff]  ;;  %v2149_v6 = vld [vmem:[%s3560_s1 + $0xf8] sm:$0xff] }
 0xe60   :  { %2710 = vmatprep.subr.mxu0 %v2150_v48 }
 0xe61   :  { %v1948_v16 = vsub.f32 %v3448_v5, %v1944_v15  ;;  %v1953_v20 = vmul.f32 %v1949_v49, %v1949_v49  ;;  %2711 = vmatpush3.msra.mxu0 %v2150_v48  ;;  %v2147_v15 = vld [vmem:[%s3560_s1 + $0xe8] sm:$0xff] }
 0xe62   :  { %v1940_v21 = vpop.xlane.xlu0 %1939  ;;  %2712 = vmatprep.subr.mxu0 %v2149_v6 }
 0xe63   :  { %v1946_v17 = vmul.f32 0.03125, %v1940_v21  ;;  %v1959_v22 = vsel %vm113_vm4, %v1953_v20, 0.0  ;;  %v1952_v18 = vmul.f32 %v1948_v16, %v1948_v16  ;;  %2713 = vmatpush3.msra.mxu0 %v2149_v6  ;;  %v2145_v20 = vld [vmem:[%s3560_s1 + $0xd8] sm:$0xff]  ;;  %v2144_v21 = vld [vmem:[%s3560_s1 + $0xd0] sm:$0xff] }
 0xe64   :  { %1960 = vadd.xlane.f32.xlu1 %v1959_v22  ;;  %v2142_v22 = vld [vmem:[%s3560_s1 + $0xc0] sm:$0xff] }
 0xe65   :  { %v1950_v23 = vsub.f32 %v3456_v9, %v1946_v17  ;;  %v1956_v41 = vsel %vm113_vm4, %v1952_v18, 0.0  ;;  %v2143_v17 = vld [vmem:[%s3560_s1 + $0xc8] sm:$0xff] }
 0xe66   :  { %1957 = vadd.xlane.f32.xlu0 %v1956_v41  ;;  %v1943_v24 = vpop.xlane.xlu0 %1942  ;;  %v2348_v18 = vld [vmem:[%s3561_s2 + $0x89] ss:$0 sm:$0xff] }
 0xe67   :  { %v1947_v25 = vmul.f32 0.03125, %v1943_v24  ;;  %v1954_v19 = vmul.f32 %v1950_v23, %v1950_v23 }
 0xe69   :  { %v1951_v40 = vsub.f32 %v3458_v47, %v1947_v25  ;;  %v1962_v26 = vsel %vm113_vm4, %v1954_v19, 0.0 }
 0xe6a   :  { %1963 = vadd.xlane.f32.xlu0 %v1962_v26 }
 0xe6b   :  { %v1955_v27 = vmul.f32 %v1951_v40, %v1951_v40 }
 0xe6d   :  { %v1965_v29 = vsel %vm113_vm4, %v1955_v27, 0.0 }
 0xe6e   :  { %1966 = vadd.xlane.f32.xlu1 %v1965_v29 }
 0xeed   :  { %v1961_v34 = vpop.xlane.xlu1 %1960 }
 0xeee   :  { %v1969_v35 = vmul.f32 0.03125, %v1961_v34 }
 0xeef   :  { %v1958_v36 = vpop.xlane.xlu0 %1957 }
 0xef0   :  { %v1973_v37 = vadd.f32 1e-05, %v1969_v35  ;;  %v1968_v53 = vmul.f32 0.03125, %v1958_v36 }
 0xef2   :  { %2837 = vrsqrt.f32 %v1973_v37  ;;  %v1972_v38 = vadd.f32 1e-05, %v1968_v53 }
 0xef3   :  { %v1964_v39 = vpop.xlane.xlu0 %1963 }
 0xef4   :  { %2839 = vrsqrt.f32 %v1972_v38  ;;  %v1970_v51 = vmul.f32 0.03125, %v1964_v39 }
 0xef6   :  { %v1974_v42 = vadd.f32 1e-05, %v1970_v51 }
 0xef7   :  { %v1967_v43 = vpop.xlane.xlu1 %1966 }
 0xef8   :  { %2841 = vrsqrt.f32 %v1974_v42  ;;  %v1971_v44 = vmul.f32 0.03125, %v1967_v43 }
 0xefa   :  { %v1975_v45 = vadd.f32 1e-05, %v1971_v44 }
 0xefc   :  { %2843 = vrsqrt.f32 %v1975_v45 }
 0xeff   :  { %v2838_v46 = vpop.eup %2837 }
 0xf00   :  { %v1981_v57 = vmul.f32 %v2838_v46, %v1949_v49  ;;  %v2148_v49 = vld [vmem:[%s3560_s1 + $0xf0] sm:$0xff] }
 0xf01   :  { %v2840_v8 = vpop.eup %2839  ;;  %2714 = vmatprep.subr.mxu0 %v2148_v49 }
 0xf02   :  { %v1980_v50 = vmul.f32 %v2840_v8, %v1948_v16  ;;  %v1989_v55 = vmul.f32 %v2346_v52, %v1981_v57  ;;  %2715 = vmatpush3.msra.mxu0 %v2148_v49  ;;  %v2146_v16 = vld [vmem:[%s3560_s1 + $0xe0] sm:$0xff]  ;;  %s2857_s1 = scalar_lea.vmem %s2262_s9, 512 }
 0xf03   :  { %2716 = vmatprep.subr.mxu0 %v2147_v15  ;;  %p2858_p0 = scmp.ne.s32.totalorder %s2262_s9, %s2857_s1  ;;  %p2863_p2 = scmp.lt.s32.totalorder %s2857_s1, %s2857_s1 }
 0xf04   :  { %v1988_v56 = vmul.f32 %v2346_v52, %v1980_v50  ;;  %v1997_v62 = vadd.f32 %v2347_v58, %v1989_v55  ;;  %2717 = vmatpush3.msra.mxu0 %v2147_v15 }
 0xf05   :  { %v2842_v59 = vpop.eup %2841  ;;  %2718 = vmatprep.subr.mxu0 %v2146_v16  ;;  %p2864_p3 = por %p2863_p2, %p2862_p1 }
 0xf06   :  { %v1996_v60 = vadd.f32 %v2347_v58, %v1988_v56  ;;  %v1982_v0 = vmul.f32 %v2842_v59, %v1950_v23  ;;  %2719 = vmatpush3.msra.mxu0 %v2146_v16 }
 0xf07   :  { %2720 = vmatprep.subr.mxu0 %v2145_v20  ;;  %p2865_p4 = pnand %p2864_p3, %p2858_p0 }
 0xf08   :  { %2690 = vmatprep.mubr.msk.f32.mxu1 %vm113_vm4, %v1996_v60  ;;  %v1990_v63 = vmul.f32 %v2346_v52, %v1982_v0  ;;  %2721 = vmatpush3.msra.mxu0 %v2145_v20 }
 0xf09   :  { %v2844_v1 = vpop.eup %2843  ;;  %2691 = vmatmul.mubr.msk.f32.vlgmr.msra.gmra.mxu1 %vm113_vm4, %v1997_v62  ;;  %2722 = vmatprep.subr.mxu0 %v2144_v21 }
 0xf0a   :  { %v1998_v2 = vadd.f32 %v2347_v58, %v1990_v63  ;;  %v1983_v7 = vmul.f32 %v2844_v1, %v1951_v40  ;;  %2723 = vmatpush3.msra.mxu0 %v2144_v21 }
 0xf0b   :  { %2724 = vmatprep.subr.mxu0 %v2143_v17 }
 0xf0c   :  { %2693 = vmatprep.mubr.msk.f32.mxu1 %vm113_vm4, %v1998_v2  ;;  %v1991_v10 = vmul.f32 %v2346_v52, %v1983_v7  ;;  %2725 = vmatpush3.msra.mxu0 %v2143_v17 }
 0xf0d   :  { %2726 = vmatprep.subr.mxu0 %v2142_v22 }
 0xf0e   :  { %v1999_v32 = vadd.f32 %v2347_v58, %v1991_v10  ;;  %2727 = vmatpush3.msra.mxu0 %v2142_v22 }
 0xf10   :  { %2694 = vmatmul.mubr.msk.f32.gmra.mxu1 %vm113_vm4, %v1999_v32 }
 0xfc9   :  { %v2692_v23 = vpop.f32.mrf.mxu1 }
 0xfca   :  { %v2093_v41 = vadd.f32 %v2692_v23, %v2348_v18 }
 0xfcb   :  { %v2087_v24 = vpop.f32.mrf.mxu1 }
 0xfcc   :  { %v2107_v25 = vmul.f32 %v2093_v41, %v2093_v41  ;;  %v2088_v19 = vadd.f32 %v2348_v18, %v2087_v24 }
 0xfce   :  { %v2111_v40 = vmul.f32 %v2107_v25, %v2093_v41  ;;  %v2106_v26 = vmul.f32 %v2088_v19, %v2088_v19 }
 0xfd0   :  { %v2115_v27 = vmul.f32 0.044715, %v2111_v40  ;;  %v2110_v29 = vmul.f32 %v2106_v26, %v2088_v19  ;;  %v2695_v30 = vpop.f32.mrf.mxu1 }
 0xfd1   :  { %v2103_v54 = vadd.f32 %v2695_v30, %v2348_v18 }
 0xfd2   :  { %v2119_v33 = vadd.f32 %v2115_v27, %v2093_v41  ;;  %v2114_v61 = vmul.f32 0.044715, %v2110_v29  ;;  %v2097_v34 = vpop.f32.mrf.mxu1 }
 0xfd3   :  { %v2109_v35 = vmul.f32 %v2103_v54, %v2103_v54  ;;  %v2098_v36 = vadd.f32 %v2348_v18, %v2097_v34 }
 0xfd4   :  { %v2123_v37 = vmul.f32 0.7978846, %v2119_v33  ;;  %v2118_v53 = vadd.f32 %v2114_v61, %v2088_v19 }
 0xfd5   :  { %v2113_v38 = vmul.f32 %v2109_v35, %v2103_v54  ;;  %v2108_v39 = vmul.f32 %v2098_v36, %v2098_v36 }
 0xfd6   :  { %2845 = vtanh.f32 %v2123_v37  ;;  %v2122_v51 = vmul.f32 0.7978846, %v2118_v53 }
 0xfd7   :  { %v2117_v42 = vmul.f32 0.044715, %v2113_v38  ;;  %v2112_v43 = vmul.f32 %v2108_v39, %v2098_v36 }
 0xfd8   :  { %2847 = vtanh.f32 %v2122_v51 }
 0xfd9   :  { %v2121_v44 = vadd.f32 %v2117_v42, %v2103_v54  ;;  %v2116_v45 = vmul.f32 0.044715, %v2112_v43 }
 0xfdb   :  { %v2125_v46 = vmul.f32 0.7978846, %v2121_v44  ;;  %v2120_v57 = vadd.f32 %v2116_v45, %v2098_v36 }
 0xfdd   :  { %2849 = vtanh.f32 %v2125_v46  ;;  %v2124_v52 = vmul.f32 0.7978846, %v2120_v57 }
 0xfdf   :  { %2851 = vtanh.f32 %v2124_v52 }
 0xfe3   :  { %v2846_v8 = vpop.eup %2845 }
 0xfe4   :  { %v2131_v50 = vadd.f32 1.0, %v2846_v8 }
 0xfe5   :  { %v2848_v55 = vpop.eup %2847 }
 0xfe6   :  { %v2130_v58 = vadd.f32 1.0, %v2848_v55  ;;  %v2135_v56 = vmul.f32 0.5, %v2131_v50 }
 0xfe8   :  { %v2134_v59 = vmul.f32 0.5, %v2130_v58  ;;  %v2139_v62 = vmul.f32 %v2135_v56, %v2093_v41 }
 0xfea   :  { %v2850_v60 = vpop.eup %2849  ;;  %v2138_v0 = vmul.f32 %v2134_v59, %v2088_v19 }
 0xfeb   :  { %v2133_v63 = vadd.f32 1.0, %v2850_v60 }
 0xfec   :  { %v2852_v1 = vpop.eup %2851  ;;  %2728 = vmatprep.mubr.f32.mxu0 %v2138_v0 }
 0xfed   :  { %2729 = vmatmul.mubr.f32.vlgmr.msra.gmra.mxu0 %v2139_v62  ;;  %v2132_v2 = vadd.f32 1.0, %v2852_v1  ;;  %v2137_v7 = vmul.f32 0.5, %v2133_v63 }
 0xfef   :  { %v2136_v10 = vmul.f32 0.5, %v2132_v2  ;;  %v2141_v11 = vmul.f32 %v2137_v7, %v2103_v54 }
 0xff1   :  { %v2140_v32 = vmul.f32 %v2136_v10, %v2098_v36 }
 0xff3   :  { %2731 = vmatprep.mubr.f32.mxu0 %v2140_v32 }
 0xff4   :  { %2732 = vmatmul.mubr.f32.gmra.mxu0 %v2141_v11 }
0x10ad   :  { %v2730_v3 = vpop.f32.mrf.mxu0 }
0x10ae   :  { %v2235_v31 = vadd.f32 %v2730_v3, %v2353_v28 }
0x10af   :  { %v2229_v12 = vpop.f32.mrf.mxu0 }
0x10b0   :  { %v2249_v13 = vadd.f32 %v2235_v31, %v3445_v4  ;;  %v2230_v14 = vadd.f32 %v2353_v28, %v2229_v12 }
0x10b2   :  { %2253 = vst.msk [vmem:[#allocation2 + $0x8] sm:$0xff] %vm113_vm4, %v2249_v13  ;;  %v2248_v48 = vadd.f32 %v2230_v14, %v3448_v5 }
0x10b4   :  { %2252 = vst.msk [vmem:[#allocation2] sm:$0xff] %vm113_vm4, %v2248_v48  ;;  %v2733_v6 = vpop.f32.mrf.mxu0 }
0x10b5   :  { %v2245_v49 = vadd.f32 %v2733_v6, %v2353_v28 }
0x10b6   :  { %v2239_v15 = vpop.f32.mrf.mxu0 }
0x10b7   :  { %v2251_v16 = vadd.f32 %v2245_v49, %v3458_v47  ;;  %v2240_v20 = vadd.f32 %v2353_v28, %v2239_v15 }
0x10b9   :  { %2255 = vst.msk [vmem:[#allocation2 + $0x18] sm:$0xff] %vm113_vm4, %v2251_v16  ;;  %v2250_v21 = vadd.f32 %v2240_v20, %v3456_v9 }
0x10bb   :  { %2254 = vst.msk [vmem:[#allocation2 + $0x10] sm:$0xff] %vm113_vm4, %v2250_v21 }
0x10bc   :  { %2868 = shalt.err (!%p2865_p4)
}
0x10bd   :  { %s2884_s10 = smov 128   ;;  %s2885_s11 = smov 8  }
0x10be   :  { %2267 = dma.vmem_to_hbm [thread:$0]  %s2262_s9, 512, %s3562_s3, [#allocation3], %s2884_s10, %s2884_s10, %s2885_s11  }
0x10bf   :  { %2877 = dma.done.wait [#allocation3], 512  }
0x10c0   :  { %2878 = vsyncadd [#allocation3], 4294966784 }
0x10c1   :  { %2271 = vsyncpa [#allocation3], 1 }

</bundles_post_ra>
